<compile_context>
chip_gen: v5e
topology: v5e:2x2
jax: 0.10.0
libtpu: 0.0.40
codegen_flags: <defaults>
</compile_context>

<pallas_src>
import functools

import jax
import jax.numpy as jnp
from jax.experimental import pallas as pl
from jax.experimental.pallas import tpu as pltpu


# --------------------------------------------------------------------------- #
# Single fused kernel: whole forward in one invocation.
#   obs_ref : (T*BN, D)  time-major rows (row = t*BN + b*N + n)
#   h0_ref  : (BN, H)    initial hidden state
#   bias_ref: (BN, BN)   block-diagonal softmax bias (0 in-batch, -1e30 cross)
#   wi/wh   : (D,3H)/(H,3H) fused GRU gate weights, gate order [r|z|n]
#   bi/bh   : (1,3H)      bi = b_i + [b_hr, b_hz, 0];  bh = [0, 0, b_hn]
#   wkqv    : (H, 3*H2)   fused key/query/value projection,  bkqv: (1, 3*H2)
#   w2,b2,w3,b3 : head (FC2 / FC3)
# Outputs:
#   out_ref : (T*BN, A)  head output, time-major rows (reordered in wrapper)
#   fh_ref  : (BN, H)    final_hidden from the second attention pass
# Scratch:
#   seq_ref : (T*BN, H)  per-step hidden states of the second GRU pass
# --------------------------------------------------------------------------- #
def actor_kernel(obs_ref, h0_ref, bias_ref,
                 wi_ref, wh_ref, bi_ref, bh_ref,
                 wkqv_ref, bkqv_ref,
                 w2_ref, b2_ref, w3_ref, b3_ref,
                 out_ref, fh_ref, seq_ref,
                 *, T, B, N, H, use_tanh):
    BN = B * N
    H2 = H // 2

    wh = wh_ref[...]
    bh = bh_ref[...]

    # Hoisted, fused input projection for all T steps (shared by both passes):
    # one (T*BN, D) @ (D, 3H) matmul instead of 2 * T * 3 tiny ones.
    gi_all = jnp.dot(obs_ref[...], wi_ref[...],
                     preferred_element_type=jnp.float32) + bi_ref[...]   # (T*BN, 3H)

    def gru_pass(h, collect):
        # Fully unrolled recurrence; only h @ W_h is on the serial chain.
        for t in range(T):
            gi = gi_all[t * BN:(t + 1) * BN]                              # (BN, 3H)
            gh = jnp.dot(h, wh, preferred_element_type=jnp.float32) + bh  # (BN, 3H)
            r = jax.nn.sigmoid(gi[:, 0:H] + gh[:, 0:H])
            z = jax.nn.sigmoid(gi[:, H:2 * H] + gh[:, H:2 * H])
            n = jnp.tanh(gi[:, 2 * H:3 * H] + r * gh[:, 2 * H:3 * H])
            h = (1.0 - z) * n + z * h
            if collect:
                seq_ref[t * BN:(t + 1) * BN, :] = h
        return h

    wkqv = wkqv_ref[...]
    bkqv = bkqv_ref[...]
    mask_bias = bias_ref[...]
    scale = 1.0 / float(H2) ** 0.5

    def attention(h_bn):
        # Fused k/q/v projection over all B*N agents in one matmul.
        kqv = jnp.tanh(jnp.dot(h_bn, wkqv,
                               preferred_element_type=jnp.float32) + bkqv)  # (BN, 3*H2)
        k = kqv[:, 0:H2]
        q = kqv[:, H2:2 * H2]
        v = kqv[:, 2 * H2:3 * H2]
        # Batched scores with block-diagonal mask == per-batch k @ q^T softmax.
        w = jnp.dot(k, q.T, preferred_element_type=jnp.float32) * scale + mask_bias
        w = w - jnp.max(w, axis=-1, keepdims=True)
        e = jnp.exp(w)
        att = e / jnp.sum(e, axis=-1, keepdims=True)
        o = jnp.dot(att, v, preferred_element_type=jnp.float32)            # (BN, H2)
        return jnp.concatenate([k, o], axis=-1)                             # (BN, H)

    # Pass 1: only the final hidden state is consumed (per-step outputs are
    # discarded by the reference), so nothing is stored.
    h1 = gru_pass(h0_ref[...], collect=False)
    fh1 = attention(h1)

    # Pass 2: seeded with final_hidden; per-step states feed the output head.
    h2 = gru_pass(fh1, collect=True)
    fh_ref[...] = attention(h2)

    # Head: one big matmul over all T*BN rows.
    x = seq_ref[...]                                                        # (T*BN, H)
    y = jnp.maximum(
        jnp.dot(x, w2_ref[...], preferred_element_type=jnp.float32) + b2_ref[...], 0.0)
    logits = jnp.dot(y, w3_ref[...], preferred_element_type=jnp.float32) + b3_ref[...]
    if use_tanh:
        out_ref[...] = jnp.tanh(logits)
    else:
        logits = logits - jnp.max(logits, axis=-1, keepdims=True)
        e = jnp.exp(logits)
        out_ref[...] = e / jnp.sum(e, axis=-1, keepdims=True)


# --------------------------------------------------------------------------- #
# Full forward (hidden_data-provided branch of Actor.forward).
# --------------------------------------------------------------------------- #
def actor_forward(obs, hidden, params, *, scenario="simple_spread"):
    B, N, T, D = obs.shape
    H = hidden.shape[-1]
    BN = B * N
    A = params["w3"].shape[-1]
    use_tanh = scenario in ("simple_spread", "simple_reference")

    # torch: obs.view(B*N, T, D); kernel consumes time-major rows (t*BN + b*N + n).
    obs_tm = jnp.transpose(obs.reshape(BN, T, D), (1, 0, 2)).reshape(T * BN, D)

    # Block-diagonal additive softmax bias: agents attend only within their batch.
    batch_id = jnp.arange(BN, dtype=jnp.int32) // N
    mask_bias = jnp.where(batch_id[:, None] == batch_id[None, :],
                          0.0, -1e30).astype(jnp.float32)

    kernel = functools.partial(actor_kernel, T=T, B=B, N=N, H=H, use_tanh=use_tanh)
    out_tm, fh2 = pl.pallas_call(
        kernel,
        out_shape=[jax.ShapeDtypeStruct((T * BN, A), jnp.float32),
                   jax.ShapeDtypeStruct((BN, H), jnp.float32)],
        scratch_shapes=[pltpu.VMEM((T * BN, H), jnp.float32)],
    )(obs_tm, hidden, mask_bias,
      params["wi"], params["wh"], params["bi"], params["bh"],
      params["wkqv"], params["bkqv"],
      params["w2"], params["b2"], params["w3"], params["b3"])

    # Kernel rows are time-major (t, b, n); torch's result_2.view(B, N*T, H)
    # is agent-major / time-minor within a batch element -> reorder (tiny copy).
    out = out_tm.reshape(T, B, N, A).transpose(1, 2, 0, 3).reshape(B, N * T, A)
    out = jnp.squeeze(out)                        # torch .squeeze()
    return out, fh2.reshape(B, N, H)


# --------------------------------------------------------------------------- #
# Deterministic parameter construction (shapes follow Actor.__init__), packed
# into the fused layouts the kernel expects.
# --------------------------------------------------------------------------- #
def init_params(key, D, H, A):
    H2 = H // 2
    ks = jax.random.split(key, 7)

    def lin(k, out_dim, in_dim, scale=0.1):
        kw, kb = jax.random.split(k)
        w = jax.random.normal(kw, (out_dim, in_dim), jnp.float32) * scale
        b = jax.random.normal(kb, (out_dim,), jnp.float32) * scale
        return w, b

    # nn.GRU: weight_ih_l0 (3H, D), weight_hh_l0 (3H, H), biases (3H,), gates [r;z;n]
    w_ih, b_ih = lin(ks[0], 3 * H, D)
    w_hh, b_hh = lin(ks[1], 3 * H, H)

    wi = jnp.transpose(w_ih)                      # (D, 3H), columns [r|z|n]
    wh = jnp.transpose(w_hh)                      # (H, 3H)
    # b_hr / b_hz fold into the hoisted input-side bias; b_hn stays hidden-side
    # (it sits inside the r * (.) term of the candidate gate).
    bi = b_ih.at[:2 * H].add(b_hh[:2 * H]).reshape(1, 3 * H)
    bh = jnp.concatenate([jnp.zeros((2 * H,), jnp.float32),
                          b_hh[2 * H:]]).reshape(1, 3 * H)

    wk, bk = lin(ks[2], H2, H)
    wq, bq = lin(ks[3], H2, H)
    wv, bv = lin(ks[4], H2, H)
    wkqv = jnp.concatenate([wk.T, wq.T, wv.T], axis=1)       # (H, 3*H2)
    bkqv = jnp.concatenate([bk, bq, bv]).reshape(1, 3 * H2)

    w2, b2 = lin(ks[5], H, H)
    w3, b3 = lin(ks[6], A, H)

    return dict(wi=wi, wh=wh, bi=bi, bh=bh,
                wkqv=wkqv, bkqv=bkqv,
                w2=w2.T, b2=b2.reshape(1, H),
                w3=w3.T, b3=b3.reshape(1, A))


if __name__ == "__main__":
    B, N, T, D, H, A = 2, 4, 8, 16, 32, 8   # batch, n_agents, seq, dim_obs, rnn_hidden, dim_action

    key = jax.random.PRNGKey(0)
    k_obs, k_h, k_p = jax.random.split(key, 3)
    obs = jax.random.normal(k_obs, (B, N, T, D), jnp.float32)
    hidden = jax.random.normal(k_h, (B * N, H), jnp.float32)   # hidden_data argument
    params = init_params(k_p, D, H, A)

    fwd = jax.jit(functools.partial(actor_forward, scenario="simple_spread"))
    result2, final_hidden = fwd(obs, hidden, params)
    jax.block_until_ready((result2, final_hidden))

    assert result2.shape == (B, N * T, A)
    assert final_hidden.shape == (B, N, H)
    assert bool(jnp.all(jnp.isfinite(result2)))
    assert bool(jnp.all(jnp.isfinite(final_hidden)))
    print("KERNEL_OK")
</pallas_src>

<mosaic_0001>
module attributes {stable_mosaic.version = 11 : i64} {
  func.func @actor_kernel(%arg0: memref<64x16xf32, #tpu.memory_space<vmem>>, %arg1: memref<8x32xf32, #tpu.memory_space<vmem>>, %arg2: memref<8x8xf32, #tpu.memory_space<vmem>>, %arg3: memref<16x96xf32, #tpu.memory_space<vmem>>, %arg4: memref<32x96xf32, #tpu.memory_space<vmem>>, %arg5: memref<1x96xf32, #tpu.memory_space<vmem>>, %arg6: memref<1x96xf32, #tpu.memory_space<vmem>>, %arg7: memref<32x48xf32, #tpu.memory_space<vmem>>, %arg8: memref<1x48xf32, #tpu.memory_space<vmem>>, %arg9: memref<32x32xf32, #tpu.memory_space<vmem>>, %arg10: memref<1x32xf32, #tpu.memory_space<vmem>>, %arg11: memref<32x8xf32, #tpu.memory_space<vmem>>, %arg12: memref<1x8xf32, #tpu.memory_space<vmem>>, %arg13: memref<64x8xf32, #tpu.memory_space<vmem>>, %arg14: memref<8x32xf32, #tpu.memory_space<vmem>>, %arg15: memref<64x32xf32, #tpu.memory_space<vmem>>) attributes {dimension_semantics = [], scalar_prefetch = 0 : i64, scratch_operands = 1 : i64, tpu.core_type = #tpu.core_type<tc>} {
    %c0 = arith.constant 0 : index
    %c0_0 = arith.constant 0 : index
    %0 = vector.load %arg4[%c0, %c0_0] : memref<32x96xf32, #tpu.memory_space<vmem>>, vector<32x96xf32>
    %c0_1 = arith.constant 0 : index
    %c0_2 = arith.constant 0 : index
    %1 = vector.load %arg6[%c0_1, %c0_2] : memref<1x96xf32, #tpu.memory_space<vmem>>, vector<1x96xf32>
    %c0_3 = arith.constant 0 : index
    %c0_4 = arith.constant 0 : index
    %2 = vector.load %arg0[%c0_3, %c0_4] : memref<64x16xf32, #tpu.memory_space<vmem>>, vector<64x16xf32>
    %c0_5 = arith.constant 0 : index
    %c0_6 = arith.constant 0 : index
    %3 = vector.load %arg3[%c0_5, %c0_6] : memref<16x96xf32, #tpu.memory_space<vmem>>, vector<16x96xf32>
    %cst = arith.constant dense<0.000000e+00> : vector<64x96xf32>
    %4 = tpu.matmul %2, %3, %cst {dimension_numbers = #tpu.dot_dimension_numbers<[1], [0], [0], [1], [0, 0, 1, 1], [], []>} : vector<64x16xf32>, vector<16x96xf32>, vector<64x96xf32> -> vector<64x96xf32>
    %c0_7 = arith.constant 0 : index
    %c0_8 = arith.constant 0 : index
    %5 = vector.load %arg5[%c0_7, %c0_8] : memref<1x96xf32, #tpu.memory_space<vmem>>, vector<1x96xf32>
    %6 = vector.broadcast %5 : vector<1x96xf32> to vector<64x96xf32>
    %7 = arith.addf %4, %6 : vector<64x96xf32>
    %c0_9 = arith.constant 0 : index
    %c0_10 = arith.constant 0 : index
    %8 = vector.load %arg7[%c0_9, %c0_10] : memref<32x48xf32, #tpu.memory_space<vmem>>, vector<32x48xf32>
    %c0_11 = arith.constant 0 : index
    %c0_12 = arith.constant 0 : index
    %9 = vector.load %arg8[%c0_11, %c0_12] : memref<1x48xf32, #tpu.memory_space<vmem>>, vector<1x48xf32>
    %c0_13 = arith.constant 0 : index
    %c0_14 = arith.constant 0 : index
    %10 = vector.load %arg2[%c0_13, %c0_14] : memref<8x8xf32, #tpu.memory_space<vmem>>, vector<8x8xf32>
    %c0_15 = arith.constant 0 : index
    %c0_16 = arith.constant 0 : index
    %11 = vector.load %arg1[%c0_15, %c0_16] : memref<8x32xf32, #tpu.memory_space<vmem>>, vector<8x32xf32>
    %12 = vector.extract_strided_slice %7 {offsets = [0, 0], sizes = [8, 96], strides = [1, 1]} : vector<64x96xf32> to vector<8x96xf32>
    %cst_17 = arith.constant dense<0.000000e+00> : vector<8x96xf32>
    %13 = tpu.matmul %11, %0, %cst_17 {dimension_numbers = #tpu.dot_dimension_numbers<[1], [0], [0], [1], [0, 0, 1, 1], [], []>} : vector<8x32xf32>, vector<32x96xf32>, vector<8x96xf32> -> vector<8x96xf32>
    %14 = vector.broadcast %1 : vector<1x96xf32> to vector<8x96xf32>
    %15 = arith.addf %13, %14 : vector<8x96xf32>
    %16 = vector.extract_strided_slice %12 {offsets = [0, 0], sizes = [8, 32], strides = [1, 1]} : vector<8x96xf32> to vector<8x32xf32>
    %17 = vector.extract_strided_slice %15 {offsets = [0, 0], sizes = [8, 32], strides = [1, 1]} : vector<8x96xf32> to vector<8x32xf32>
    %18 = arith.addf %16, %17 : vector<8x32xf32>
    %19 = arith.negf %18 : vector<8x32xf32>
    %20 = math.exp %19 : vector<8x32xf32>
    %cst_18 = arith.constant 1.000000e+00 : f32
    %21 = vector.broadcast %cst_18 : f32 to vector<8x32xf32>
    %22 = arith.addf %21, %20 : vector<8x32xf32>
    %23 = arith.divf %21, %22 : vector<8x32xf32>
    %24 = vector.extract_strided_slice %12 {offsets = [0, 32], sizes = [8, 32], strides = [1, 1]} : vector<8x96xf32> to vector<8x32xf32>
    %25 = vector.extract_strided_slice %15 {offsets = [0, 32], sizes = [8, 32], strides = [1, 1]} : vector<8x96xf32> to vector<8x32xf32>
    %26 = arith.addf %24, %25 : vector<8x32xf32>
    %27 = arith.negf %26 : vector<8x32xf32>
    %28 = math.exp %27 : vector<8x32xf32>
    %cst_19 = arith.constant 1.000000e+00 : f32
    %29 = vector.broadcast %cst_19 : f32 to vector<8x32xf32>
    %30 = arith.addf %29, %28 : vector<8x32xf32>
    %31 = arith.divf %29, %30 : vector<8x32xf32>
    %32 = vector.extract_strided_slice %12 {offsets = [0, 64], sizes = [8, 32], strides = [1, 1]} : vector<8x96xf32> to vector<8x32xf32>
    %33 = vector.extract_strided_slice %15 {offsets = [0, 64], sizes = [8, 32], strides = [1, 1]} : vector<8x96xf32> to vector<8x32xf32>
    %34 = arith.mulf %23, %33 : vector<8x32xf32>
    %35 = arith.addf %32, %34 : vector<8x32xf32>
    %36 = math.tanh %35 : vector<8x32xf32>
    %cst_20 = arith.constant 1.000000e+00 : f32
    %37 = vector.broadcast %cst_20 : f32 to vector<8x32xf32>
    %38 = arith.subf %37, %31 : vector<8x32xf32>
    %39 = arith.mulf %38, %36 : vector<8x32xf32>
    %40 = arith.mulf %31, %11 : vector<8x32xf32>
    %41 = arith.addf %39, %40 : vector<8x32xf32>
    %42 = vector.extract_strided_slice %7 {offsets = [8, 0], sizes = [8, 96], strides = [1, 1]} : vector<64x96xf32> to vector<8x96xf32>
    %cst_21 = arith.constant dense<0.000000e+00> : vector<8x96xf32>
    %43 = tpu.matmul %41, %0, %cst_21 {dimension_numbers = #tpu.dot_dimension_numbers<[1], [0], [0], [1], [0, 0, 1, 1], [], []>} : vector<8x32xf32>, vector<32x96xf32>, vector<8x96xf32> -> vector<8x96xf32>
    %44 = vector.broadcast %1 : vector<1x96xf32> to vector<8x96xf32>
    %45 = arith.addf %43, %44 : vector<8x96xf32>
    %46 = vector.extract_strided_slice %42 {offsets = [0, 0], sizes = [8, 32], strides = [1, 1]} : vector<8x96xf32> to vector<8x32xf32>
    %47 = vector.extract_strided_slice %45 {offsets = [0, 0], sizes = [8, 32], strides = [1, 1]} : vector<8x96xf32> to vector<8x32xf32>
    %48 = arith.addf %46, %47 : vector<8x32xf32>
    %49 = arith.negf %48 : vector<8x32xf32>
    %50 = math.exp %49 : vector<8x32xf32>
    %cst_22 = arith.constant 1.000000e+00 : f32
    %51 = vector.broadcast %cst_22 : f32 to vector<8x32xf32>
    %52 = arith.addf %51, %50 : vector<8x32xf32>
    %53 = arith.divf %51, %52 : vector<8x32xf32>
    %54 = vector.extract_strided_slice %42 {offsets = [0, 32], sizes = [8, 32], strides = [1, 1]} : vector<8x96xf32> to vector<8x32xf32>
    %55 = vector.extract_strided_slice %45 {offsets = [0, 32], sizes = [8, 32], strides = [1, 1]} : vector<8x96xf32> to vector<8x32xf32>
    %56 = arith.addf %54, %55 : vector<8x32xf32>
    %57 = arith.negf %56 : vector<8x32xf32>
    %58 = math.exp %57 : vector<8x32xf32>
    %cst_23 = arith.constant 1.000000e+00 : f32
    %59 = vector.broadcast %cst_23 : f32 to vector<8x32xf32>
    %60 = arith.addf %59, %58 : vector<8x32xf32>
    %61 = arith.divf %59, %60 : vector<8x32xf32>
    %62 = vector.extract_strided_slice %42 {offsets = [0, 64], sizes = [8, 32], strides = [1, 1]} : vector<8x96xf32> to vector<8x32xf32>
    %63 = vector.extract_strided_slice %45 {offsets = [0, 64], sizes = [8, 32], strides = [1, 1]} : vector<8x96xf32> to vector<8x32xf32>
    %64 = arith.mulf %53, %63 : vector<8x32xf32>
    %65 = arith.addf %62, %64 : vector<8x32xf32>
    %66 = math.tanh %65 : vector<8x32xf32>
    %cst_24 = arith.constant 1.000000e+00 : f32
    %67 = vector.broadcast %cst_24 : f32 to vector<8x32xf32>
    %68 = arith.subf %67, %61 : vector<8x32xf32>
    %69 = arith.mulf %68, %66 : vector<8x32xf32>
    %70 = arith.mulf %61, %41 : vector<8x32xf32>
    %71 = arith.addf %69, %70 : vector<8x32xf32>
    %72 = vector.extract_strided_slice %7 {offsets = [16, 0], sizes = [8, 96], strides = [1, 1]} : vector<64x96xf32> to vector<8x96xf32>
    %cst_25 = arith.constant dense<0.000000e+00> : vector<8x96xf32>
    %73 = tpu.matmul %71, %0, %cst_25 {dimension_numbers = #tpu.dot_dimension_numbers<[1], [0], [0], [1], [0, 0, 1, 1], [], []>} : vector<8x32xf32>, vector<32x96xf32>, vector<8x96xf32> -> vector<8x96xf32>
    %74 = vector.broadcast %1 : vector<1x96xf32> to vector<8x96xf32>
    %75 = arith.addf %73, %74 : vector<8x96xf32>
    %76 = vector.extract_strided_slice %72 {offsets = [0, 0], sizes = [8, 32], strides = [1, 1]} : vector<8x96xf32> to vector<8x32xf32>
    %77 = vector.extract_strided_slice %75 {offsets = [0, 0], sizes = [8, 32], strides = [1, 1]} : vector<8x96xf32> to vector<8x32xf32>
    %78 = arith.addf %76, %77 : vector<8x32xf32>
    %79 = arith.negf %78 : vector<8x32xf32>
    %80 = math.exp %79 : vector<8x32xf32>
    %cst_26 = arith.constant 1.000000e+00 : f32
    %81 = vector.broadcast %cst_26 : f32 to vector<8x32xf32>
    %82 = arith.addf %81, %80 : vector<8x32xf32>
    %83 = arith.divf %81, %82 : vector<8x32xf32>
    %84 = vector.extract_strided_slice %72 {offsets = [0, 32], sizes = [8, 32], strides = [1, 1]} : vector<8x96xf32> to vector<8x32xf32>
    %85 = vector.extract_strided_slice %75 {offsets = [0, 32], sizes = [8, 32], strides = [1, 1]} : vector<8x96xf32> to vector<8x32xf32>
    %86 = arith.addf %84, %85 : vector<8x32xf32>
    %87 = arith.negf %86 : vector<8x32xf32>
    %88 = math.exp %87 : vector<8x32xf32>
    %cst_27 = arith.constant 1.000000e+00 : f32
    %89 = vector.broadcast %cst_27 : f32 to vector<8x32xf32>
    %90 = arith.addf %89, %88 : vector<8x32xf32>
    %91 = arith.divf %89, %90 : vector<8x32xf32>
    %92 = vector.extract_strided_slice %72 {offsets = [0, 64], sizes = [8, 32], strides = [1, 1]} : vector<8x96xf32> to vector<8x32xf32>
    %93 = vector.extract_strided_slice %75 {offsets = [0, 64], sizes = [8, 32], strides = [1, 1]} : vector<8x96xf32> to vector<8x32xf32>
    %94 = arith.mulf %83, %93 : vector<8x32xf32>
    %95 = arith.addf %92, %94 : vector<8x32xf32>
    %96 = math.tanh %95 : vector<8x32xf32>
    %cst_28 = arith.constant 1.000000e+00 : f32
    %97 = vector.broadcast %cst_28 : f32 to vector<8x32xf32>
    %98 = arith.subf %97, %91 : vector<8x32xf32>
    %99 = arith.mulf %98, %96 : vector<8x32xf32>
    %100 = arith.mulf %91, %71 : vector<8x32xf32>
    %101 = arith.addf %99, %100 : vector<8x32xf32>
    %102 = vector.extract_strided_slice %7 {offsets = [24, 0], sizes = [8, 96], strides = [1, 1]} : vector<64x96xf32> to vector<8x96xf32>
    %cst_29 = arith.constant dense<0.000000e+00> : vector<8x96xf32>
    %103 = tpu.matmul %101, %0, %cst_29 {dimension_numbers = #tpu.dot_dimension_numbers<[1], [0], [0], [1], [0, 0, 1, 1], [], []>} : vector<8x32xf32>, vector<32x96xf32>, vector<8x96xf32> -> vector<8x96xf32>
    %104 = vector.broadcast %1 : vector<1x96xf32> to vector<8x96xf32>
    %105 = arith.addf %103, %104 : vector<8x96xf32>
    %106 = vector.extract_strided_slice %102 {offsets = [0, 0], sizes = [8, 32], strides = [1, 1]} : vector<8x96xf32> to vector<8x32xf32>
    %107 = vector.extract_strided_slice %105 {offsets = [0, 0], sizes = [8, 32], strides = [1, 1]} : vector<8x96xf32> to vector<8x32xf32>
    %108 = arith.addf %106, %107 : vector<8x32xf32>
    %109 = arith.negf %108 : vector<8x32xf32>
    %110 = math.exp %109 : vector<8x32xf32>
    %cst_30 = arith.constant 1.000000e+00 : f32
    %111 = vector.broadcast %cst_30 : f32 to vector<8x32xf32>
    %112 = arith.addf %111, %110 : vector<8x32xf32>
    %113 = arith.divf %111, %112 : vector<8x32xf32>
    %114 = vector.extract_strided_slice %102 {offsets = [0, 32], sizes = [8, 32], strides = [1, 1]} : vector<8x96xf32> to vector<8x32xf32>
    %115 = vector.extract_strided_slice %105 {offsets = [0, 32], sizes = [8, 32], strides = [1, 1]} : vector<8x96xf32> to vector<8x32xf32>
    %116 = arith.addf %114, %115 : vector<8x32xf32>
    %117 = arith.negf %116 : vector<8x32xf32>
    %118 = math.exp %117 : vector<8x32xf32>
    %cst_31 = arith.constant 1.000000e+00 : f32
    %119 = vector.broadcast %cst_31 : f32 to vector<8x32xf32>
    %120 = arith.addf %119, %118 : vector<8x32xf32>
    %121 = arith.divf %119, %120 : vector<8x32xf32>
    %122 = vector.extract_strided_slice %102 {offsets = [0, 64], sizes = [8, 32], strides = [1, 1]} : vector<8x96xf32> to vector<8x32xf32>
    %123 = vector.extract_strided_slice %105 {offsets = [0, 64], sizes = [8, 32], strides = [1, 1]} : vector<8x96xf32> to vector<8x32xf32>
    %124 = arith.mulf %113, %123 : vector<8x32xf32>
    %125 = arith.addf %122, %124 : vector<8x32xf32>
    %126 = math.tanh %125 : vector<8x32xf32>
    %cst_32 = arith.constant 1.000000e+00 : f32
    %127 = vector.broadcast %cst_32 : f32 to vector<8x32xf32>
    %128 = arith.subf %127, %121 : vector<8x32xf32>
    %129 = arith.mulf %128, %126 : vector<8x32xf32>
    %130 = arith.mulf %121, %101 : vector<8x32xf32>
    %131 = arith.addf %129, %130 : vector<8x32xf32>
    %132 = vector.extract_strided_slice %7 {offsets = [32, 0], sizes = [8, 96], strides = [1, 1]} : vector<64x96xf32> to vector<8x96xf32>
    %cst_33 = arith.constant dense<0.000000e+00> : vector<8x96xf32>
    %133 = tpu.matmul %131, %0, %cst_33 {dimension_numbers = #tpu.dot_dimension_numbers<[1], [0], [0], [1], [0, 0, 1, 1], [], []>} : vector<8x32xf32>, vector<32x96xf32>, vector<8x96xf32> -> vector<8x96xf32>
    %134 = vector.broadcast %1 : vector<1x96xf32> to vector<8x96xf32>
    %135 = arith.addf %133, %134 : vector<8x96xf32>
    %136 = vector.extract_strided_slice %132 {offsets = [0, 0], sizes = [8, 32], strides = [1, 1]} : vector<8x96xf32> to vector<8x32xf32>
    %137 = vector.extract_strided_slice %135 {offsets = [0, 0], sizes = [8, 32], strides = [1, 1]} : vector<8x96xf32> to vector<8x32xf32>
    %138 = arith.addf %136, %137 : vector<8x32xf32>
    %139 = arith.negf %138 : vector<8x32xf32>
    %140 = math.exp %139 : vector<8x32xf32>
    %cst_34 = arith.constant 1.000000e+00 : f32
    %141 = vector.broadcast %cst_34 : f32 to vector<8x32xf32>
    %142 = arith.addf %141, %140 : vector<8x32xf32>
    %143 = arith.divf %141, %142 : vector<8x32xf32>
    %144 = vector.extract_strided_slice %132 {offsets = [0, 32], sizes = [8, 32], strides = [1, 1]} : vector<8x96xf32> to vector<8x32xf32>
    %145 = vector.extract_strided_slice %135 {offsets = [0, 32], sizes = [8, 32], strides = [1, 1]} : vector<8x96xf32> to vector<8x32xf32>
    %146 = arith.addf %144, %145 : vector<8x32xf32>
    %147 = arith.negf %146 : vector<8x32xf32>
    %148 = math.exp %147 : vector<8x32xf32>
    %cst_35 = arith.constant 1.000000e+00 : f32
    %149 = vector.broadcast %cst_35 : f32 to vector<8x32xf32>
    %150 = arith.addf %149, %148 : vector<8x32xf32>
    %151 = arith.divf %149, %150 : vector<8x32xf32>
    %152 = vector.extract_strided_slice %132 {offsets = [0, 64], sizes = [8, 32], strides = [1, 1]} : vector<8x96xf32> to vector<8x32xf32>
    %153 = vector.extract_strided_slice %135 {offsets = [0, 64], sizes = [8, 32], strides = [1, 1]} : vector<8x96xf32> to vector<8x32xf32>
    %154 = arith.mulf %143, %153 : vector<8x32xf32>
    %155 = arith.addf %152, %154 : vector<8x32xf32>
    %156 = math.tanh %155 : vector<8x32xf32>
    %cst_36 = arith.constant 1.000000e+00 : f32
    %157 = vector.broadcast %cst_36 : f32 to vector<8x32xf32>
    %158 = arith.subf %157, %151 : vector<8x32xf32>
    %159 = arith.mulf %158, %156 : vector<8x32xf32>
    %160 = arith.mulf %151, %131 : vector<8x32xf32>
    %161 = arith.addf %159, %160 : vector<8x32xf32>
    %162 = vector.extract_strided_slice %7 {offsets = [40, 0], sizes = [8, 96], strides = [1, 1]} : vector<64x96xf32> to vector<8x96xf32>
    %cst_37 = arith.constant dense<0.000000e+00> : vector<8x96xf32>
    %163 = tpu.matmul %161, %0, %cst_37 {dimension_numbers = #tpu.dot_dimension_numbers<[1], [0], [0], [1], [0, 0, 1, 1], [], []>} : vector<8x32xf32>, vector<32x96xf32>, vector<8x96xf32> -> vector<8x96xf32>
    %164 = vector.broadcast %1 : vector<1x96xf32> to vector<8x96xf32>
    %165 = arith.addf %163, %164 : vector<8x96xf32>
    %166 = vector.extract_strided_slice %162 {offsets = [0, 0], sizes = [8, 32], strides = [1, 1]} : vector<8x96xf32> to vector<8x32xf32>
    %167 = vector.extract_strided_slice %165 {offsets = [0, 0], sizes = [8, 32], strides = [1, 1]} : vector<8x96xf32> to vector<8x32xf32>
    %168 = arith.addf %166, %167 : vector<8x32xf32>
    %169 = arith.negf %168 : vector<8x32xf32>
    %170 = math.exp %169 : vector<8x32xf32>
    %cst_38 = arith.constant 1.000000e+00 : f32
    %171 = vector.broadcast %cst_38 : f32 to vector<8x32xf32>
    %172 = arith.addf %171, %170 : vector<8x32xf32>
    %173 = arith.divf %171, %172 : vector<8x32xf32>
    %174 = vector.extract_strided_slice %162 {offsets = [0, 32], sizes = [8, 32], strides = [1, 1]} : vector<8x96xf32> to vector<8x32xf32>
    %175 = vector.extract_strided_slice %165 {offsets = [0, 32], sizes = [8, 32], strides = [1, 1]} : vector<8x96xf32> to vector<8x32xf32>
    %176 = arith.addf %174, %175 : vector<8x32xf32>
    %177 = arith.negf %176 : vector<8x32xf32>
    %178 = math.exp %177 : vector<8x32xf32>
    %cst_39 = arith.constant 1.000000e+00 : f32
    %179 = vector.broadcast %cst_39 : f32 to vector<8x32xf32>
    %180 = arith.addf %179, %178 : vector<8x32xf32>
    %181 = arith.divf %179, %180 : vector<8x32xf32>
    %182 = vector.extract_strided_slice %162 {offsets = [0, 64], sizes = [8, 32], strides = [1, 1]} : vector<8x96xf32> to vector<8x32xf32>
    %183 = vector.extract_strided_slice %165 {offsets = [0, 64], sizes = [8, 32], strides = [1, 1]} : vector<8x96xf32> to vector<8x32xf32>
    %184 = arith.mulf %173, %183 : vector<8x32xf32>
    %185 = arith.addf %182, %184 : vector<8x32xf32>
    %186 = math.tanh %185 : vector<8x32xf32>
    %cst_40 = arith.constant 1.000000e+00 : f32
    %187 = vector.broadcast %cst_40 : f32 to vector<8x32xf32>
    %188 = arith.subf %187, %181 : vector<8x32xf32>
    %189 = arith.mulf %188, %186 : vector<8x32xf32>
    %190 = arith.mulf %181, %161 : vector<8x32xf32>
    %191 = arith.addf %189, %190 : vector<8x32xf32>
    %192 = vector.extract_strided_slice %7 {offsets = [48, 0], sizes = [8, 96], strides = [1, 1]} : vector<64x96xf32> to vector<8x96xf32>
    %cst_41 = arith.constant dense<0.000000e+00> : vector<8x96xf32>
    %193 = tpu.matmul %191, %0, %cst_41 {dimension_numbers = #tpu.dot_dimension_numbers<[1], [0], [0], [1], [0, 0, 1, 1], [], []>} : vector<8x32xf32>, vector<32x96xf32>, vector<8x96xf32> -> vector<8x96xf32>
    %194 = vector.broadcast %1 : vector<1x96xf32> to vector<8x96xf32>
    %195 = arith.addf %193, %194 : vector<8x96xf32>
    %196 = vector.extract_strided_slice %192 {offsets = [0, 0], sizes = [8, 32], strides = [1, 1]} : vector<8x96xf32> to vector<8x32xf32>
    %197 = vector.extract_strided_slice %195 {offsets = [0, 0], sizes = [8, 32], strides = [1, 1]} : vector<8x96xf32> to vector<8x32xf32>
    %198 = arith.addf %196, %197 : vector<8x32xf32>
    %199 = arith.negf %198 : vector<8x32xf32>
    %200 = math.exp %199 : vector<8x32xf32>
    %cst_42 = arith.constant 1.000000e+00 : f32
    %201 = vector.broadcast %cst_42 : f32 to vector<8x32xf32>
    %202 = arith.addf %201, %200 : vector<8x32xf32>
    %203 = arith.divf %201, %202 : vector<8x32xf32>
    %204 = vector.extract_strided_slice %192 {offsets = [0, 32], sizes = [8, 32], strides = [1, 1]} : vector<8x96xf32> to vector<8x32xf32>
    %205 = vector.extract_strided_slice %195 {offsets = [0, 32], sizes = [8, 32], strides = [1, 1]} : vector<8x96xf32> to vector<8x32xf32>
    %206 = arith.addf %204, %205 : vector<8x32xf32>
    %207 = arith.negf %206 : vector<8x32xf32>
    %208 = math.exp %207 : vector<8x32xf32>
    %cst_43 = arith.constant 1.000000e+00 : f32
    %209 = vector.broadcast %cst_43 : f32 to vector<8x32xf32>
    %210 = arith.addf %209, %208 : vector<8x32xf32>
    %211 = arith.divf %209, %210 : vector<8x32xf32>
    %212 = vector.extract_strided_slice %192 {offsets = [0, 64], sizes = [8, 32], strides = [1, 1]} : vector<8x96xf32> to vector<8x32xf32>
    %213 = vector.extract_strided_slice %195 {offsets = [0, 64], sizes = [8, 32], strides = [1, 1]} : vector<8x96xf32> to vector<8x32xf32>
    %214 = arith.mulf %203, %213 : vector<8x32xf32>
    %215 = arith.addf %212, %214 : vector<8x32xf32>
    %216 = math.tanh %215 : vector<8x32xf32>
    %cst_44 = arith.constant 1.000000e+00 : f32
    %217 = vector.broadcast %cst_44 : f32 to vector<8x32xf32>
    %218 = arith.subf %217, %211 : vector<8x32xf32>
    %219 = arith.mulf %218, %216 : vector<8x32xf32>
    %220 = arith.mulf %211, %191 : vector<8x32xf32>
    %221 = arith.addf %219, %220 : vector<8x32xf32>
    %222 = vector.extract_strided_slice %7 {offsets = [56, 0], sizes = [8, 96], strides = [1, 1]} : vector<64x96xf32> to vector<8x96xf32>
    %cst_45 = arith.constant dense<0.000000e+00> : vector<8x96xf32>
    %223 = tpu.matmul %221, %0, %cst_45 {dimension_numbers = #tpu.dot_dimension_numbers<[1], [0], [0], [1], [0, 0, 1, 1], [], []>} : vector<8x32xf32>, vector<32x96xf32>, vector<8x96xf32> -> vector<8x96xf32>
    %224 = vector.broadcast %1 : vector<1x96xf32> to vector<8x96xf32>
    %225 = arith.addf %223, %224 : vector<8x96xf32>
    %226 = vector.extract_strided_slice %222 {offsets = [0, 0], sizes = [8, 32], strides = [1, 1]} : vector<8x96xf32> to vector<8x32xf32>
    %227 = vector.extract_strided_slice %225 {offsets = [0, 0], sizes = [8, 32], strides = [1, 1]} : vector<8x96xf32> to vector<8x32xf32>
    %228 = arith.addf %226, %227 : vector<8x32xf32>
    %229 = arith.negf %228 : vector<8x32xf32>
    %230 = math.exp %229 : vector<8x32xf32>
    %cst_46 = arith.constant 1.000000e+00 : f32
    %231 = vector.broadcast %cst_46 : f32 to vector<8x32xf32>
    %232 = arith.addf %231, %230 : vector<8x32xf32>
    %233 = arith.divf %231, %232 : vector<8x32xf32>
    %234 = vector.extract_strided_slice %222 {offsets = [0, 32], sizes = [8, 32], strides = [1, 1]} : vector<8x96xf32> to vector<8x32xf32>
    %235 = vector.extract_strided_slice %225 {offsets = [0, 32], sizes = [8, 32], strides = [1, 1]} : vector<8x96xf32> to vector<8x32xf32>
    %236 = arith.addf %234, %235 : vector<8x32xf32>
    %237 = arith.negf %236 : vector<8x32xf32>
    %238 = math.exp %237 : vector<8x32xf32>
    %cst_47 = arith.constant 1.000000e+00 : f32
    %239 = vector.broadcast %cst_47 : f32 to vector<8x32xf32>
    %240 = arith.addf %239, %238 : vector<8x32xf32>
    %241 = arith.divf %239, %240 : vector<8x32xf32>
    %242 = vector.extract_strided_slice %222 {offsets = [0, 64], sizes = [8, 32], strides = [1, 1]} : vector<8x96xf32> to vector<8x32xf32>
    %243 = vector.extract_strided_slice %225 {offsets = [0, 64], sizes = [8, 32], strides = [1, 1]} : vector<8x96xf32> to vector<8x32xf32>
    %244 = arith.mulf %233, %243 : vector<8x32xf32>
    %245 = arith.addf %242, %244 : vector<8x32xf32>
    %246 = math.tanh %245 : vector<8x32xf32>
    %cst_48 = arith.constant 1.000000e+00 : f32
    %247 = vector.broadcast %cst_48 : f32 to vector<8x32xf32>
    %248 = arith.subf %247, %241 : vector<8x32xf32>
    %249 = arith.mulf %248, %246 : vector<8x32xf32>
    %250 = arith.mulf %241, %221 : vector<8x32xf32>
    %251 = arith.addf %249, %250 : vector<8x32xf32>
    %cst_49 = arith.constant dense<0.000000e+00> : vector<8x48xf32>
    %252 = tpu.matmul %251, %8, %cst_49 {dimension_numbers = #tpu.dot_dimension_numbers<[1], [0], [0], [1], [0, 0, 1, 1], [], []>} : vector<8x32xf32>, vector<32x48xf32>, vector<8x48xf32> -> vector<8x48xf32>
    %253 = vector.broadcast %9 : vector<1x48xf32> to vector<8x48xf32>
    %254 = arith.addf %252, %253 : vector<8x48xf32>
    %255 = math.tanh %254 : vector<8x48xf32>
    %256 = vector.extract_strided_slice %255 {offsets = [0, 0], sizes = [8, 16], strides = [1, 1]} : vector<8x48xf32> to vector<8x16xf32>
    %257 = vector.extract_strided_slice %255 {offsets = [0, 16], sizes = [8, 16], strides = [1, 1]} : vector<8x48xf32> to vector<8x16xf32>
    %258 = vector.extract_strided_slice %255 {offsets = [0, 32], sizes = [8, 16], strides = [1, 1]} : vector<8x48xf32> to vector<8x16xf32>
    %259 = tpu.transpose %257, [1, 0] : vector<8x16xf32> -> vector<16x8xf32>
    %cst_50 = arith.constant dense<0.000000e+00> : vector<8x8xf32>
    %260 = tpu.matmul %256, %259, %cst_50 {dimension_numbers = #tpu.dot_dimension_numbers<[1], [0], [0], [1], [0, 0, 1, 1], [], []>} : vector<8x16xf32>, vector<16x8xf32>, vector<8x8xf32> -> vector<8x8xf32>
    %cst_51 = arith.constant 2.500000e-01 : f32
    %261 = vector.broadcast %cst_51 : f32 to vector<8x8xf32>
    %262 = arith.mulf %260, %261 : vector<8x8xf32>
    %263 = arith.addf %262, %10 : vector<8x8xf32>
    %cst_52 = arith.constant dense<0xFF800000> : vector<8xf32>
    %264 = vector.multi_reduction <maximumf>, %263, %cst_52 [1] : vector<8x8xf32> to vector<8xf32>
    %265 = vector.shape_cast %264 : vector<8xf32> to vector<8x1xf32>
    %266 = vector.broadcast %265 : vector<8x1xf32> to vector<8x8xf32>
    %267 = arith.subf %263, %266 : vector<8x8xf32>
    %268 = math.exp %267 : vector<8x8xf32>
    %cst_53 = arith.constant dense<0.000000e+00> : vector<8xf32>
    %269 = vector.multi_reduction <add>, %268, %cst_53 [1] : vector<8x8xf32> to vector<8xf32>
    %270 = vector.shape_cast %269 : vector<8xf32> to vector<8x1xf32>
    %271 = vector.broadcast %270 : vector<8x1xf32> to vector<8x8xf32>
    %272 = arith.divf %268, %271 : vector<8x8xf32>
    %cst_54 = arith.constant dense<0.000000e+00> : vector<8x16xf32>
    %273 = tpu.matmul %272, %258, %cst_54 {dimension_numbers = #tpu.dot_dimension_numbers<[1], [0], [0], [1], [0, 0, 1, 1], [], []>} : vector<8x8xf32>, vector<8x16xf32>, vector<8x16xf32> -> vector<8x16xf32>
    %274 = tpu.concatenate %256, %273 in 1 : vector<8x16xf32>, vector<8x16xf32> -> vector<8x32xf32>
    %275 = vector.extract_strided_slice %7 {offsets = [0, 0], sizes = [8, 96], strides = [1, 1]} : vector<64x96xf32> to vector<8x96xf32>
    %cst_55 = arith.constant dense<0.000000e+00> : vector<8x96xf32>
    %276 = tpu.matmul %274, %0, %cst_55 {dimension_numbers = #tpu.dot_dimension_numbers<[1], [0], [0], [1], [0, 0, 1, 1], [], []>} : vector<8x32xf32>, vector<32x96xf32>, vector<8x96xf32> -> vector<8x96xf32>
    %277 = vector.broadcast %1 : vector<1x96xf32> to vector<8x96xf32>
    %278 = arith.addf %276, %277 : vector<8x96xf32>
    %279 = vector.extract_strided_slice %275 {offsets = [0, 0], sizes = [8, 32], strides = [1, 1]} : vector<8x96xf32> to vector<8x32xf32>
    %280 = vector.extract_strided_slice %278 {offsets = [0, 0], sizes = [8, 32], strides = [1, 1]} : vector<8x96xf32> to vector<8x32xf32>
    %281 = arith.addf %279, %280 : vector<8x32xf32>
    %282 = arith.negf %281 : vector<8x32xf32>
    %283 = math.exp %282 : vector<8x32xf32>
    %cst_56 = arith.constant 1.000000e+00 : f32
    %284 = vector.broadcast %cst_56 : f32 to vector<8x32xf32>
    %285 = arith.addf %284, %283 : vector<8x32xf32>
    %286 = arith.divf %284, %285 : vector<8x32xf32>
    %287 = vector.extract_strided_slice %275 {offsets = [0, 32], sizes = [8, 32], strides = [1, 1]} : vector<8x96xf32> to vector<8x32xf32>
    %288 = vector.extract_strided_slice %278 {offsets = [0, 32], sizes = [8, 32], strides = [1, 1]} : vector<8x96xf32> to vector<8x32xf32>
    %289 = arith.addf %287, %288 : vector<8x32xf32>
    %290 = arith.negf %289 : vector<8x32xf32>
    %291 = math.exp %290 : vector<8x32xf32>
    %cst_57 = arith.constant 1.000000e+00 : f32
    %292 = vector.broadcast %cst_57 : f32 to vector<8x32xf32>
    %293 = arith.addf %292, %291 : vector<8x32xf32>
    %294 = arith.divf %292, %293 : vector<8x32xf32>
    %295 = vector.extract_strided_slice %275 {offsets = [0, 64], sizes = [8, 32], strides = [1, 1]} : vector<8x96xf32> to vector<8x32xf32>
    %296 = vector.extract_strided_slice %278 {offsets = [0, 64], sizes = [8, 32], strides = [1, 1]} : vector<8x96xf32> to vector<8x32xf32>
    %297 = arith.mulf %286, %296 : vector<8x32xf32>
    %298 = arith.addf %295, %297 : vector<8x32xf32>
    %299 = math.tanh %298 : vector<8x32xf32>
    %cst_58 = arith.constant 1.000000e+00 : f32
    %300 = vector.broadcast %cst_58 : f32 to vector<8x32xf32>
    %301 = arith.subf %300, %294 : vector<8x32xf32>
    %302 = arith.mulf %301, %299 : vector<8x32xf32>
    %303 = arith.mulf %294, %274 : vector<8x32xf32>
    %304 = arith.addf %302, %303 : vector<8x32xf32>
    %c0_59 = arith.constant 0 : index
    %c0_60 = arith.constant 0 : index
    %305 = vector.load %arg15[%c0_59, %c0_60] : memref<64x32xf32, #tpu.memory_space<vmem>>, vector<8x32xf32>
    tpu.vector_store %arg15[%c0_59, %c0_60], %304 {strides = array<i32>} : memref<64x32xf32, #tpu.memory_space<vmem>>, vector<8x32xf32>,
    %306 = vector.extract_strided_slice %7 {offsets = [8, 0], sizes = [8, 96], strides = [1, 1]} : vector<64x96xf32> to vector<8x96xf32>
    %cst_61 = arith.constant dense<0.000000e+00> : vector<8x96xf32>
    %307 = tpu.matmul %304, %0, %cst_61 {dimension_numbers = #tpu.dot_dimension_numbers<[1], [0], [0], [1], [0, 0, 1, 1], [], []>} : vector<8x32xf32>, vector<32x96xf32>, vector<8x96xf32> -> vector<8x96xf32>
    %308 = vector.broadcast %1 : vector<1x96xf32> to vector<8x96xf32>
    %309 = arith.addf %307, %308 : vector<8x96xf32>
    %310 = vector.extract_strided_slice %306 {offsets = [0, 0], sizes = [8, 32], strides = [1, 1]} : vector<8x96xf32> to vector<8x32xf32>
    %311 = vector.extract_strided_slice %309 {offsets = [0, 0], sizes = [8, 32], strides = [1, 1]} : vector<8x96xf32> to vector<8x32xf32>
    %312 = arith.addf %310, %311 : vector<8x32xf32>
    %313 = arith.negf %312 : vector<8x32xf32>
    %314 = math.exp %313 : vector<8x32xf32>
    %cst_62 = arith.constant 1.000000e+00 : f32
    %315 = vector.broadcast %cst_62 : f32 to vector<8x32xf32>
    %316 = arith.addf %315, %314 : vector<8x32xf32>
    %317 = arith.divf %315, %316 : vector<8x32xf32>
    %318 = vector.extract_strided_slice %306 {offsets = [0, 32], sizes = [8, 32], strides = [1, 1]} : vector<8x96xf32> to vector<8x32xf32>
    %319 = vector.extract_strided_slice %309 {offsets = [0, 32], sizes = [8, 32], strides = [1, 1]} : vector<8x96xf32> to vector<8x32xf32>
    %320 = arith.addf %318, %319 : vector<8x32xf32>
    %321 = arith.negf %320 : vector<8x32xf32>
    %322 = math.exp %321 : vector<8x32xf32>
    %cst_63 = arith.constant 1.000000e+00 : f32
    %323 = vector.broadcast %cst_63 : f32 to vector<8x32xf32>
    %324 = arith.addf %323, %322 : vector<8x32xf32>
    %325 = arith.divf %323, %324 : vector<8x32xf32>
    %326 = vector.extract_strided_slice %306 {offsets = [0, 64], sizes = [8, 32], strides = [1, 1]} : vector<8x96xf32> to vector<8x32xf32>
    %327 = vector.extract_strided_slice %309 {offsets = [0, 64], sizes = [8, 32], strides = [1, 1]} : vector<8x96xf32> to vector<8x32xf32>
    %328 = arith.mulf %317, %327 : vector<8x32xf32>
    %329 = arith.addf %326, %328 : vector<8x32xf32>
    %330 = math.tanh %329 : vector<8x32xf32>
    %cst_64 = arith.constant 1.000000e+00 : f32
    %331 = vector.broadcast %cst_64 : f32 to vector<8x32xf32>
    %332 = arith.subf %331, %325 : vector<8x32xf32>
    %333 = arith.mulf %332, %330 : vector<8x32xf32>
    %334 = arith.mulf %325, %304 : vector<8x32xf32>
    %335 = arith.addf %333, %334 : vector<8x32xf32>
    %c8 = arith.constant 8 : index
    %c0_65 = arith.constant 0 : index
    %336 = vector.load %arg15[%c8, %c0_65] : memref<64x32xf32, #tpu.memory_space<vmem>>, vector<8x32xf32>
    tpu.vector_store %arg15[%c8, %c0_65], %335 {strides = array<i32>} : memref<64x32xf32, #tpu.memory_space<vmem>>, vector<8x32xf32>,
    %337 = vector.extract_strided_slice %7 {offsets = [16, 0], sizes = [8, 96], strides = [1, 1]} : vector<64x96xf32> to vector<8x96xf32>
    %cst_66 = arith.constant dense<0.000000e+00> : vector<8x96xf32>
    %338 = tpu.matmul %335, %0, %cst_66 {dimension_numbers = #tpu.dot_dimension_numbers<[1], [0], [0], [1], [0, 0, 1, 1], [], []>} : vector<8x32xf32>, vector<32x96xf32>, vector<8x96xf32> -> vector<8x96xf32>
    %339 = vector.broadcast %1 : vector<1x96xf32> to vector<8x96xf32>
    %340 = arith.addf %338, %339 : vector<8x96xf32>
    %341 = vector.extract_strided_slice %337 {offsets = [0, 0], sizes = [8, 32], strides = [1, 1]} : vector<8x96xf32> to vector<8x32xf32>
    %342 = vector.extract_strided_slice %340 {offsets = [0, 0], sizes = [8, 32], strides = [1, 1]} : vector<8x96xf32> to vector<8x32xf32>
    %343 = arith.addf %341, %342 : vector<8x32xf32>
    %344 = arith.negf %343 : vector<8x32xf32>
    %345 = math.exp %344 : vector<8x32xf32>
    %cst_67 = arith.constant 1.000000e+00 : f32
    %346 = vector.broadcast %cst_67 : f32 to vector<8x32xf32>
    %347 = arith.addf %346, %345 : vector<8x32xf32>
    %348 = arith.divf %346, %347 : vector<8x32xf32>
    %349 = vector.extract_strided_slice %337 {offsets = [0, 32], sizes = [8, 32], strides = [1, 1]} : vector<8x96xf32> to vector<8x32xf32>
    %350 = vector.extract_strided_slice %340 {offsets = [0, 32], sizes = [8, 32], strides = [1, 1]} : vector<8x96xf32> to vector<8x32xf32>
    %351 = arith.addf %349, %350 : vector<8x32xf32>
    %352 = arith.negf %351 : vector<8x32xf32>
    %353 = math.exp %352 : vector<8x32xf32>
    %cst_68 = arith.constant 1.000000e+00 : f32
    %354 = vector.broadcast %cst_68 : f32 to vector<8x32xf32>
    %355 = arith.addf %354, %353 : vector<8x32xf32>
    %356 = arith.divf %354, %355 : vector<8x32xf32>
    %357 = vector.extract_strided_slice %337 {offsets = [0, 64], sizes = [8, 32], strides = [1, 1]} : vector<8x96xf32> to vector<8x32xf32>
    %358 = vector.extract_strided_slice %340 {offsets = [0, 64], sizes = [8, 32], strides = [1, 1]} : vector<8x96xf32> to vector<8x32xf32>
    %359 = arith.mulf %348, %358 : vector<8x32xf32>
    %360 = arith.addf %357, %359 : vector<8x32xf32>
    %361 = math.tanh %360 : vector<8x32xf32>
    %cst_69 = arith.constant 1.000000e+00 : f32
    %362 = vector.broadcast %cst_69 : f32 to vector<8x32xf32>
    %363 = arith.subf %362, %356 : vector<8x32xf32>
    %364 = arith.mulf %363, %361 : vector<8x32xf32>
    %365 = arith.mulf %356, %335 : vector<8x32xf32>
    %366 = arith.addf %364, %365 : vector<8x32xf32>
    %c16 = arith.constant 16 : index
    %c0_70 = arith.constant 0 : index
    %367 = vector.load %arg15[%c16, %c0_70] : memref<64x32xf32, #tpu.memory_space<vmem>>, vector<8x32xf32>
    tpu.vector_store %arg15[%c16, %c0_70], %366 {strides = array<i32>} : memref<64x32xf32, #tpu.memory_space<vmem>>, vector<8x32xf32>,
    %368 = vector.extract_strided_slice %7 {offsets = [24, 0], sizes = [8, 96], strides = [1, 1]} : vector<64x96xf32> to vector<8x96xf32>
    %cst_71 = arith.constant dense<0.000000e+00> : vector<8x96xf32>
    %369 = tpu.matmul %366, %0, %cst_71 {dimension_numbers = #tpu.dot_dimension_numbers<[1], [0], [0], [1], [0, 0, 1, 1], [], []>} : vector<8x32xf32>, vector<32x96xf32>, vector<8x96xf32> -> vector<8x96xf32>
    %370 = vector.broadcast %1 : vector<1x96xf32> to vector<8x96xf32>
    %371 = arith.addf %369, %370 : vector<8x96xf32>
    %372 = vector.extract_strided_slice %368 {offsets = [0, 0], sizes = [8, 32], strides = [1, 1]} : vector<8x96xf32> to vector<8x32xf32>
    %373 = vector.extract_strided_slice %371 {offsets = [0, 0], sizes = [8, 32], strides = [1, 1]} : vector<8x96xf32> to vector<8x32xf32>
    %374 = arith.addf %372, %373 : vector<8x32xf32>
    %375 = arith.negf %374 : vector<8x32xf32>
    %376 = math.exp %375 : vector<8x32xf32>
    %cst_72 = arith.constant 1.000000e+00 : f32
    %377 = vector.broadcast %cst_72 : f32 to vector<8x32xf32>
    %378 = arith.addf %377, %376 : vector<8x32xf32>
    %379 = arith.divf %377, %378 : vector<8x32xf32>
    %380 = vector.extract_strided_slice %368 {offsets = [0, 32], sizes = [8, 32], strides = [1, 1]} : vector<8x96xf32> to vector<8x32xf32>
    %381 = vector.extract_strided_slice %371 {offsets = [0, 32], sizes = [8, 32], strides = [1, 1]} : vector<8x96xf32> to vector<8x32xf32>
    %382 = arith.addf %380, %381 : vector<8x32xf32>
    %383 = arith.negf %382 : vector<8x32xf32>
    %384 = math.exp %383 : vector<8x32xf32>
    %cst_73 = arith.constant 1.000000e+00 : f32
    %385 = vector.broadcast %cst_73 : f32 to vector<8x32xf32>
    %386 = arith.addf %385, %384 : vector<8x32xf32>
    %387 = arith.divf %385, %386 : vector<8x32xf32>
    %388 = vector.extract_strided_slice %368 {offsets = [0, 64], sizes = [8, 32], strides = [1, 1]} : vector<8x96xf32> to vector<8x32xf32>
    %389 = vector.extract_strided_slice %371 {offsets = [0, 64], sizes = [8, 32], strides = [1, 1]} : vector<8x96xf32> to vector<8x32xf32>
    %390 = arith.mulf %379, %389 : vector<8x32xf32>
    %391 = arith.addf %388, %390 : vector<8x32xf32>
    %392 = math.tanh %391 : vector<8x32xf32>
    %cst_74 = arith.constant 1.000000e+00 : f32
    %393 = vector.broadcast %cst_74 : f32 to vector<8x32xf32>
    %394 = arith.subf %393, %387 : vector<8x32xf32>
    %395 = arith.mulf %394, %392 : vector<8x32xf32>
    %396 = arith.mulf %387, %366 : vector<8x32xf32>
    %397 = arith.addf %395, %396 : vector<8x32xf32>
    %c24 = arith.constant 24 : index
    %c0_75 = arith.constant 0 : index
    %398 = vector.load %arg15[%c24, %c0_75] : memref<64x32xf32, #tpu.memory_space<vmem>>, vector<8x32xf32>
    tpu.vector_store %arg15[%c24, %c0_75], %397 {strides = array<i32>} : memref<64x32xf32, #tpu.memory_space<vmem>>, vector<8x32xf32>,
    %399 = vector.extract_strided_slice %7 {offsets = [32, 0], sizes = [8, 96], strides = [1, 1]} : vector<64x96xf32> to vector<8x96xf32>
    %cst_76 = arith.constant dense<0.000000e+00> : vector<8x96xf32>
    %400 = tpu.matmul %397, %0, %cst_76 {dimension_numbers = #tpu.dot_dimension_numbers<[1], [0], [0], [1], [0, 0, 1, 1], [], []>} : vector<8x32xf32>, vector<32x96xf32>, vector<8x96xf32> -> vector<8x96xf32>
    %401 = vector.broadcast %1 : vector<1x96xf32> to vector<8x96xf32>
    %402 = arith.addf %400, %401 : vector<8x96xf32>
    %403 = vector.extract_strided_slice %399 {offsets = [0, 0], sizes = [8, 32], strides = [1, 1]} : vector<8x96xf32> to vector<8x32xf32>
    %404 = vector.extract_strided_slice %402 {offsets = [0, 0], sizes = [8, 32], strides = [1, 1]} : vector<8x96xf32> to vector<8x32xf32>
    %405 = arith.addf %403, %404 : vector<8x32xf32>
    %406 = arith.negf %405 : vector<8x32xf32>
    %407 = math.exp %406 : vector<8x32xf32>
    %cst_77 = arith.constant 1.000000e+00 : f32
    %408 = vector.broadcast %cst_77 : f32 to vector<8x32xf32>
    %409 = arith.addf %408, %407 : vector<8x32xf32>
    %410 = arith.divf %408, %409 : vector<8x32xf32>
    %411 = vector.extract_strided_slice %399 {offsets = [0, 32], sizes = [8, 32], strides = [1, 1]} : vector<8x96xf32> to vector<8x32xf32>
    %412 = vector.extract_strided_slice %402 {offsets = [0, 32], sizes = [8, 32], strides = [1, 1]} : vector<8x96xf32> to vector<8x32xf32>
    %413 = arith.addf %411, %412 : vector<8x32xf32>
    %414 = arith.negf %413 : vector<8x32xf32>
    %415 = math.exp %414 : vector<8x32xf32>
    %cst_78 = arith.constant 1.000000e+00 : f32
    %416 = vector.broadcast %cst_78 : f32 to vector<8x32xf32>
    %417 = arith.addf %416, %415 : vector<8x32xf32>
    %418 = arith.divf %416, %417 : vector<8x32xf32>
    %419 = vector.extract_strided_slice %399 {offsets = [0, 64], sizes = [8, 32], strides = [1, 1]} : vector<8x96xf32> to vector<8x32xf32>
    %420 = vector.extract_strided_slice %402 {offsets = [0, 64], sizes = [8, 32], strides = [1, 1]} : vector<8x96xf32> to vector<8x32xf32>
    %421 = arith.mulf %410, %420 : vector<8x32xf32>
    %422 = arith.addf %419, %421 : vector<8x32xf32>
    %423 = math.tanh %422 : vector<8x32xf32>
    %cst_79 = arith.constant 1.000000e+00 : f32
    %424 = vector.broadcast %cst_79 : f32 to vector<8x32xf32>
    %425 = arith.subf %424, %418 : vector<8x32xf32>
    %426 = arith.mulf %425, %423 : vector<8x32xf32>
    %427 = arith.mulf %418, %397 : vector<8x32xf32>
    %428 = arith.addf %426, %427 : vector<8x32xf32>
    %c32 = arith.constant 32 : index
    %c0_80 = arith.constant 0 : index
    %429 = vector.load %arg15[%c32, %c0_80] : memref<64x32xf32, #tpu.memory_space<vmem>>, vector<8x32xf32>
    tpu.vector_store %arg15[%c32, %c0_80], %428 {strides = array<i32>} : memref<64x32xf32, #tpu.memory_space<vmem>>, vector<8x32xf32>,
    %430 = vector.extract_strided_slice %7 {offsets = [40, 0], sizes = [8, 96], strides = [1, 1]} : vector<64x96xf32> to vector<8x96xf32>
    %cst_81 = arith.constant dense<0.000000e+00> : vector<8x96xf32>
    %431 = tpu.matmul %428, %0, %cst_81 {dimension_numbers = #tpu.dot_dimension_numbers<[1], [0], [0], [1], [0, 0, 1, 1], [], []>} : vector<8x32xf32>, vector<32x96xf32>, vector<8x96xf32> -> vector<8x96xf32>
    %432 = vector.broadcast %1 : vector<1x96xf32> to vector<8x96xf32>
    %433 = arith.addf %431, %432 : vector<8x96xf32>
    %434 = vector.extract_strided_slice %430 {offsets = [0, 0], sizes = [8, 32], strides = [1, 1]} : vector<8x96xf32> to vector<8x32xf32>
    %435 = vector.extract_strided_slice %433 {offsets = [0, 0], sizes = [8, 32], strides = [1, 1]} : vector<8x96xf32> to vector<8x32xf32>
    %436 = arith.addf %434, %435 : vector<8x32xf32>
    %437 = arith.negf %436 : vector<8x32xf32>
    %438 = math.exp %437 : vector<8x32xf32>
    %cst_82 = arith.constant 1.000000e+00 : f32
    %439 = vector.broadcast %cst_82 : f32 to vector<8x32xf32>
    %440 = arith.addf %439, %438 : vector<8x32xf32>
    %441 = arith.divf %439, %440 : vector<8x32xf32>
    %442 = vector.extract_strided_slice %430 {offsets = [0, 32], sizes = [8, 32], strides = [1, 1]} : vector<8x96xf32> to vector<8x32xf32>
    %443 = vector.extract_strided_slice %433 {offsets = [0, 32], sizes = [8, 32], strides = [1, 1]} : vector<8x96xf32> to vector<8x32xf32>
    %444 = arith.addf %442, %443 : vector<8x32xf32>
    %445 = arith.negf %444 : vector<8x32xf32>
    %446 = math.exp %445 : vector<8x32xf32>
    %cst_83 = arith.constant 1.000000e+00 : f32
    %447 = vector.broadcast %cst_83 : f32 to vector<8x32xf32>
    %448 = arith.addf %447, %446 : vector<8x32xf32>
    %449 = arith.divf %447, %448 : vector<8x32xf32>
    %450 = vector.extract_strided_slice %430 {offsets = [0, 64], sizes = [8, 32], strides = [1, 1]} : vector<8x96xf32> to vector<8x32xf32>
    %451 = vector.extract_strided_slice %433 {offsets = [0, 64], sizes = [8, 32], strides = [1, 1]} : vector<8x96xf32> to vector<8x32xf32>
    %452 = arith.mulf %441, %451 : vector<8x32xf32>
    %453 = arith.addf %450, %452 : vector<8x32xf32>
    %454 = math.tanh %453 : vector<8x32xf32>
    %cst_84 = arith.constant 1.000000e+00 : f32
    %455 = vector.broadcast %cst_84 : f32 to vector<8x32xf32>
    %456 = arith.subf %455, %449 : vector<8x32xf32>
    %457 = arith.mulf %456, %454 : vector<8x32xf32>
    %458 = arith.mulf %449, %428 : vector<8x32xf32>
    %459 = arith.addf %457, %458 : vector<8x32xf32>
    %c40 = arith.constant 40 : index
    %c0_85 = arith.constant 0 : index
    %460 = vector.load %arg15[%c40, %c0_85] : memref<64x32xf32, #tpu.memory_space<vmem>>, vector<8x32xf32>
    tpu.vector_store %arg15[%c40, %c0_85], %459 {strides = array<i32>} : memref<64x32xf32, #tpu.memory_space<vmem>>, vector<8x32xf32>,
    %461 = vector.extract_strided_slice %7 {offsets = [48, 0], sizes = [8, 96], strides = [1, 1]} : vector<64x96xf32> to vector<8x96xf32>
    %cst_86 = arith.constant dense<0.000000e+00> : vector<8x96xf32>
    %462 = tpu.matmul %459, %0, %cst_86 {dimension_numbers = #tpu.dot_dimension_numbers<[1], [0], [0], [1], [0, 0, 1, 1], [], []>} : vector<8x32xf32>, vector<32x96xf32>, vector<8x96xf32> -> vector<8x96xf32>
    %463 = vector.broadcast %1 : vector<1x96xf32> to vector<8x96xf32>
    %464 = arith.addf %462, %463 : vector<8x96xf32>
    %465 = vector.extract_strided_slice %461 {offsets = [0, 0], sizes = [8, 32], strides = [1, 1]} : vector<8x96xf32> to vector<8x32xf32>
    %466 = vector.extract_strided_slice %464 {offsets = [0, 0], sizes = [8, 32], strides = [1, 1]} : vector<8x96xf32> to vector<8x32xf32>
    %467 = arith.addf %465, %466 : vector<8x32xf32>
    %468 = arith.negf %467 : vector<8x32xf32>
    %469 = math.exp %468 : vector<8x32xf32>
    %cst_87 = arith.constant 1.000000e+00 : f32
    %470 = vector.broadcast %cst_87 : f32 to vector<8x32xf32>
    %471 = arith.addf %470, %469 : vector<8x32xf32>
    %472 = arith.divf %470, %471 : vector<8x32xf32>
    %473 = vector.extract_strided_slice %461 {offsets = [0, 32], sizes = [8, 32], strides = [1, 1]} : vector<8x96xf32> to vector<8x32xf32>
    %474 = vector.extract_strided_slice %464 {offsets = [0, 32], sizes = [8, 32], strides = [1, 1]} : vector<8x96xf32> to vector<8x32xf32>
    %475 = arith.addf %473, %474 : vector<8x32xf32>
    %476 = arith.negf %475 : vector<8x32xf32>
    %477 = math.exp %476 : vector<8x32xf32>
    %cst_88 = arith.constant 1.000000e+00 : f32
    %478 = vector.broadcast %cst_88 : f32 to vector<8x32xf32>
    %479 = arith.addf %478, %477 : vector<8x32xf32>
    %480 = arith.divf %478, %479 : vector<8x32xf32>
    %481 = vector.extract_strided_slice %461 {offsets = [0, 64], sizes = [8, 32], strides = [1, 1]} : vector<8x96xf32> to vector<8x32xf32>
    %482 = vector.extract_strided_slice %464 {offsets = [0, 64], sizes = [8, 32], strides = [1, 1]} : vector<8x96xf32> to vector<8x32xf32>
    %483 = arith.mulf %472, %482 : vector<8x32xf32>
    %484 = arith.addf %481, %483 : vector<8x32xf32>
    %485 = math.tanh %484 : vector<8x32xf32>
    %cst_89 = arith.constant 1.000000e+00 : f32
    %486 = vector.broadcast %cst_89 : f32 to vector<8x32xf32>
    %487 = arith.subf %486, %480 : vector<8x32xf32>
    %488 = arith.mulf %487, %485 : vector<8x32xf32>
    %489 = arith.mulf %480, %459 : vector<8x32xf32>
    %490 = arith.addf %488, %489 : vector<8x32xf32>
    %c48 = arith.constant 48 : index
    %c0_90 = arith.constant 0 : index
    %491 = vector.load %arg15[%c48, %c0_90] : memref<64x32xf32, #tpu.memory_space<vmem>>, vector<8x32xf32>
    tpu.vector_store %arg15[%c48, %c0_90], %490 {strides = array<i32>} : memref<64x32xf32, #tpu.memory_space<vmem>>, vector<8x32xf32>,
    %492 = vector.extract_strided_slice %7 {offsets = [56, 0], sizes = [8, 96], strides = [1, 1]} : vector<64x96xf32> to vector<8x96xf32>
    %cst_91 = arith.constant dense<0.000000e+00> : vector<8x96xf32>
    %493 = tpu.matmul %490, %0, %cst_91 {dimension_numbers = #tpu.dot_dimension_numbers<[1], [0], [0], [1], [0, 0, 1, 1], [], []>} : vector<8x32xf32>, vector<32x96xf32>, vector<8x96xf32> -> vector<8x96xf32>
    %494 = vector.broadcast %1 : vector<1x96xf32> to vector<8x96xf32>
    %495 = arith.addf %493, %494 : vector<8x96xf32>
    %496 = vector.extract_strided_slice %492 {offsets = [0, 0], sizes = [8, 32], strides = [1, 1]} : vector<8x96xf32> to vector<8x32xf32>
    %497 = vector.extract_strided_slice %495 {offsets = [0, 0], sizes = [8, 32], strides = [1, 1]} : vector<8x96xf32> to vector<8x32xf32>
    %498 = arith.addf %496, %497 : vector<8x32xf32>
    %499 = arith.negf %498 : vector<8x32xf32>
    %500 = math.exp %499 : vector<8x32xf32>
    %cst_92 = arith.constant 1.000000e+00 : f32
    %501 = vector.broadcast %cst_92 : f32 to vector<8x32xf32>
    %502 = arith.addf %501, %500 : vector<8x32xf32>
    %503 = arith.divf %501, %502 : vector<8x32xf32>
    %504 = vector.extract_strided_slice %492 {offsets = [0, 32], sizes = [8, 32], strides = [1, 1]} : vector<8x96xf32> to vector<8x32xf32>
    %505 = vector.extract_strided_slice %495 {offsets = [0, 32], sizes = [8, 32], strides = [1, 1]} : vector<8x96xf32> to vector<8x32xf32>
    %506 = arith.addf %504, %505 : vector<8x32xf32>
    %507 = arith.negf %506 : vector<8x32xf32>
    %508 = math.exp %507 : vector<8x32xf32>
    %cst_93 = arith.constant 1.000000e+00 : f32
    %509 = vector.broadcast %cst_93 : f32 to vector<8x32xf32>
    %510 = arith.addf %509, %508 : vector<8x32xf32>
    %511 = arith.divf %509, %510 : vector<8x32xf32>
    %512 = vector.extract_strided_slice %492 {offsets = [0, 64], sizes = [8, 32], strides = [1, 1]} : vector<8x96xf32> to vector<8x32xf32>
    %513 = vector.extract_strided_slice %495 {offsets = [0, 64], sizes = [8, 32], strides = [1, 1]} : vector<8x96xf32> to vector<8x32xf32>
    %514 = arith.mulf %503, %513 : vector<8x32xf32>
    %515 = arith.addf %512, %514 : vector<8x32xf32>
    %516 = math.tanh %515 : vector<8x32xf32>
    %cst_94 = arith.constant 1.000000e+00 : f32
    %517 = vector.broadcast %cst_94 : f32 to vector<8x32xf32>
    %518 = arith.subf %517, %511 : vector<8x32xf32>
    %519 = arith.mulf %518, %516 : vector<8x32xf32>
    %520 = arith.mulf %511, %490 : vector<8x32xf32>
    %521 = arith.addf %519, %520 : vector<8x32xf32>
    %c56 = arith.constant 56 : index
    %c0_95 = arith.constant 0 : index
    %522 = vector.load %arg15[%c56, %c0_95] : memref<64x32xf32, #tpu.memory_space<vmem>>, vector<8x32xf32>
    tpu.vector_store %arg15[%c56, %c0_95], %521 {strides = array<i32>} : memref<64x32xf32, #tpu.memory_space<vmem>>, vector<8x32xf32>,
    %cst_96 = arith.constant dense<0.000000e+00> : vector<8x48xf32>
    %523 = tpu.matmul %521, %8, %cst_96 {dimension_numbers = #tpu.dot_dimension_numbers<[1], [0], [0], [1], [0, 0, 1, 1], [], []>} : vector<8x32xf32>, vector<32x48xf32>, vector<8x48xf32> -> vector<8x48xf32>
    %524 = vector.broadcast %9 : vector<1x48xf32> to vector<8x48xf32>
    %525 = arith.addf %523, %524 : vector<8x48xf32>
    %526 = math.tanh %525 : vector<8x48xf32>
    %527 = vector.extract_strided_slice %526 {offsets = [0, 0], sizes = [8, 16], strides = [1, 1]} : vector<8x48xf32> to vector<8x16xf32>
    %528 = vector.extract_strided_slice %526 {offsets = [0, 16], sizes = [8, 16], strides = [1, 1]} : vector<8x48xf32> to vector<8x16xf32>
    %529 = vector.extract_strided_slice %526 {offsets = [0, 32], sizes = [8, 16], strides = [1, 1]} : vector<8x48xf32> to vector<8x16xf32>
    %530 = tpu.transpose %528, [1, 0] : vector<8x16xf32> -> vector<16x8xf32>
    %cst_97 = arith.constant dense<0.000000e+00> : vector<8x8xf32>
    %531 = tpu.matmul %527, %530, %cst_97 {dimension_numbers = #tpu.dot_dimension_numbers<[1], [0], [0], [1], [0, 0, 1, 1], [], []>} : vector<8x16xf32>, vector<16x8xf32>, vector<8x8xf32> -> vector<8x8xf32>
    %cst_98 = arith.constant 2.500000e-01 : f32
    %532 = vector.broadcast %cst_98 : f32 to vector<8x8xf32>
    %533 = arith.mulf %531, %532 : vector<8x8xf32>
    %534 = arith.addf %533, %10 : vector<8x8xf32>
    %cst_99 = arith.constant dense<0xFF800000> : vector<8xf32>
    %535 = vector.multi_reduction <maximumf>, %534, %cst_99 [1] : vector<8x8xf32> to vector<8xf32>
    %536 = vector.shape_cast %535 : vector<8xf32> to vector<8x1xf32>
    %537 = vector.broadcast %536 : vector<8x1xf32> to vector<8x8xf32>
    %538 = arith.subf %534, %537 : vector<8x8xf32>
    %539 = math.exp %538 : vector<8x8xf32>
    %cst_100 = arith.constant dense<0.000000e+00> : vector<8xf32>
    %540 = vector.multi_reduction <add>, %539, %cst_100 [1] : vector<8x8xf32> to vector<8xf32>
    %541 = vector.shape_cast %540 : vector<8xf32> to vector<8x1xf32>
    %542 = vector.broadcast %541 : vector<8x1xf32> to vector<8x8xf32>
    %543 = arith.divf %539, %542 : vector<8x8xf32>
    %cst_101 = arith.constant dense<0.000000e+00> : vector<8x16xf32>
    %544 = tpu.matmul %543, %529, %cst_101 {dimension_numbers = #tpu.dot_dimension_numbers<[1], [0], [0], [1], [0, 0, 1, 1], [], []>} : vector<8x8xf32>, vector<8x16xf32>, vector<8x16xf32> -> vector<8x16xf32>
    %545 = tpu.concatenate %527, %544 in 1 : vector<8x16xf32>, vector<8x16xf32> -> vector<8x32xf32>
    %c0_102 = arith.constant 0 : index
    %c0_103 = arith.constant 0 : index
    %546 = vector.load %arg14[%c0_102, %c0_103] : memref<8x32xf32, #tpu.memory_space<vmem>>, vector<8x32xf32>
    tpu.vector_store %arg14[%c0_102, %c0_103], %545 {strides = array<i32>} : memref<8x32xf32, #tpu.memory_space<vmem>>, vector<8x32xf32>,
    %c0_104 = arith.constant 0 : index
    %c0_105 = arith.constant 0 : index
    %547 = vector.load %arg15[%c0_104, %c0_105] : memref<64x32xf32, #tpu.memory_space<vmem>>, vector<64x32xf32>
    %c0_106 = arith.constant 0 : index
    %c0_107 = arith.constant 0 : index
    %548 = vector.load %arg9[%c0_106, %c0_107] : memref<32x32xf32, #tpu.memory_space<vmem>>, vector<32x32xf32>
    %cst_108 = arith.constant dense<0.000000e+00> : vector<64x32xf32>
    %549 = tpu.matmul %547, %548, %cst_108 {dimension_numbers = #tpu.dot_dimension_numbers<[1], [0], [0], [1], [0, 0, 1, 1], [], []>} : vector<64x32xf32>, vector<32x32xf32>, vector<64x32xf32> -> vector<64x32xf32>
    %c0_109 = arith.constant 0 : index
    %c0_110 = arith.constant 0 : index
    %550 = vector.load %arg10[%c0_109, %c0_110] : memref<1x32xf32, #tpu.memory_space<vmem>>, vector<1x32xf32>
    %551 = vector.broadcast %550 : vector<1x32xf32> to vector<64x32xf32>
    %552 = arith.addf %549, %551 : vector<64x32xf32>
    %cst_111 = arith.constant 0.000000e+00 : f32
    %553 = vector.broadcast %cst_111 : f32 to vector<64x32xf32>
    %554 = arith.maximumf %552, %553 : vector<64x32xf32>
    %c0_112 = arith.constant 0 : index
    %c0_113 = arith.constant 0 : index
    %555 = vector.load %arg11[%c0_112, %c0_113] : memref<32x8xf32, #tpu.memory_space<vmem>>, vector<32x8xf32>
    %cst_114 = arith.constant dense<0.000000e+00> : vector<64x8xf32>
    %556 = tpu.matmul %554, %555, %cst_114 {dimension_numbers = #tpu.dot_dimension_numbers<[1], [0], [0], [1], [0, 0, 1, 1], [], []>} : vector<64x32xf32>, vector<32x8xf32>, vector<64x8xf32> -> vector<64x8xf32>
    %c0_115 = arith.constant 0 : index
    %c0_116 = arith.constant 0 : index
    %557 = vector.load %arg12[%c0_115, %c0_116] : memref<1x8xf32, #tpu.memory_space<vmem>>, vector<1x8xf32>
    %558 = vector.broadcast %557 : vector<1x8xf32> to vector<64x8xf32>
    %559 = arith.addf %556, %558 : vector<64x8xf32>
    %560 = math.tanh %559 : vector<64x8xf32>
    %c0_117 = arith.constant 0 : index
    %c0_118 = arith.constant 0 : index
    %561 = vector.load %arg13[%c0_117, %c0_118] : memref<64x8xf32, #tpu.memory_space<vmem>>, vector<64x8xf32>
    tpu.vector_store %arg13[%c0_117, %c0_118], %560 {strides = array<i32>} : memref<64x8xf32, #tpu.memory_space<vmem>>, vector<64x8xf32>,
    return
  }
}

</mosaic_0001>

<bundles_post_ra>
// kernel: actor_forward.1
= control target key start
LH: loop header
LB: loop body
LE: loop exit
PB: predicated region body
PF: predicated region fallthrough
CT: control target
= control target key end

     0   :  { %vm66_vm0 = vcmask 130048   ;;  %s2442_s0 = inlined_call_operand.vmem [shape: f32[64,16], index: 0, kind: input, shape index: {}]   ;;  %s2443_s1 = inlined_call_operand.vmem [shape: f32[8,32], index: 1, kind: input, shape index: {}]   ;;  %s2444_s2 = inlined_call_operand.vmem [shape: f32[8,8], index: 2, kind: input, shape index: {}]   ;;  %s2445_s3 = inlined_call_operand.vmem [shape: f32[16,96], index: 3, kind: input, shape index: {}]   ;;  %s2446_s4 = inlined_call_operand.vmem [shape: f32[32,96], index: 4, kind: input, shape index: {}]   ;;  %s2447_s5 = inlined_call_operand.vmem [shape: f32[1,96], index: 5, kind: input, shape index: {}]   ;;  %s2448_s6 = inlined_call_operand.vmem [shape: f32[1,96], index: 6, kind: input, shape index: {}]   ;;  %s2449_s7 = inlined_call_operand.vmem [shape: f32[32,48], index: 7, kind: input, shape index: {}]   ;;  %s2450_s8 = inlined_call_operand.vmem [shape: f32[1,48], index: 8, kind: input, shape index: {}]   ;;  %s2451_s9 = inlined_call_operand.vmem [shape: f32[32,32], index: 9, kind: input, shape index: {}]   ;;  %s2452_s10 = inlined_call_operand.vmem [shape: f32[1,32], index: 10, kind: input, shape index: {}]   ;;  %s2453_s11 = inlined_call_operand.vmem [shape: f32[32,8], index: 11, kind: input, shape index: {}]   ;;  %s2454_s12 = inlined_call_operand.vmem [shape: f32[1,8], index: 12, kind: input, shape index: {}]   ;;  %s2455_s13 = inlined_call_operand.vmem [shape: f32[64,8], index: 13, kind: output, shape index: {0}]   ;;  %s2456_s14 = inlined_call_operand.hbm [shape: f32[8,32], index: 14, kind: output, shape index: {1}]  }
   0x1   :  { %v1930_v0 = vld [vmem:[%s2446_s4 + $0x18] sm:$0xff]  ;;  %v1935_v1 = vld [vmem:[%s2446_s4 + $0x10] sm:$0xff]  ;;  %v61_v2 = vld [vmem:[%s2445_s3 + $0x8] sm:$0xff] }
   0x2   :  { %158 = vmatpush.msra.mxu1 %v1930_v0  ;;  %105 = vmatpush.msra.mxu0 %v61_v2  ;;  %v60_v3 = vld [vmem:[%s2445_s3] sm:$0xff]  ;;  %v1947_v4 = vld [vmem:[%s2446_s4 + $0x8] sm:$0xff] }
   0x3   :  { %v52_v5 = vld [vmem:[%s2442_s0] sm:$0xff]  ;;  %289 = vmatpush.msra.mxu3 %v1930_v0  ;;  %417 = vmatpush.msra.mxu2 %v1930_v0 }
   0x4   :  { %159 = vmatpush.msra.mxu1 %v1935_v1  ;;  %106 = vmatpush.msra.mxu0 %v60_v3  ;;  %v1958_v6 = vld [vmem:[%s2446_s4] sm:$0xff] }
   0x5   :  { %1608 = vmatmul.msk.f32.vlgmr.msra.gmra.mxu0 %vm66_vm0, %v52_v5  ;;  %290 = vmatpush.msra.mxu3 %v1935_v1 }
   0x6   :  { %20 = vsyncpa [#allocation4], 0  ;;  %160 = vmatpush.msra.mxu1 %v1947_v4  ;;  %v1966_v7 = vld [vmem:[%s2443_s1] sm:$0xff]  ;;  %vm142_vm1 = vcmask 261120   ;;  %225 = vmatpush.msrb.mxu0 %v1930_v0  ;;  %s1846_s29 = smov 64   ;;  %s1848_s16 = smov 32  }
   0x7   :  { %291 = vmatpush.msra.mxu3 %v1947_v4  ;;  %418 = vmatpush.msra.mxu2 %v1935_v1  ;;  %v1999_v8 = vld [vmem:[%s2448_s6] ss:$0 sm:$0xff]  ;;  %v53_v33 = vld [vmem:[%s2442_s0 + $0x8] sm:$0xff]  ;;  %v54_v34 = vld [vmem:[%s2442_s0 + $0x10] sm:$0xff]  ;;  %s1849_s23 = smov 112  }
   0x8   :  { %161 = vmatpush.msra.mxu1 %v1958_v6  ;;  %226 = vmatpush.msrb.mxu0 %v1935_v1  ;;  %v2006_v11 = vld [vmem:[%s2447_s5] ss:$0 sm:$0xff]  ;;  %s1847_s5 = smov 96   ;;  %v55_v35 = vld [vmem:[%s2442_s0 + $0x18] sm:$0xff]  ;;  %v57_v43 = vld [vmem:[%s2442_s0 + $0x28] sm:$0xff] }
   0x9   :  { %1616 = vmatmul.msk.f32.vlgmr.msra.gmra.mxu1 %vm142_vm1, %v1966_v7  ;;  %292 = vmatpush.msra.mxu3 %v1958_v6  ;;  %v56_v37 = vld [vmem:[%s2442_s0 + $0x20] sm:$0xff]  ;;  %v58_v44 = vld [vmem:[%s2442_s0 + $0x30] sm:$0xff]  ;;  %v59_v45 = vld [vmem:[%s2442_s0 + $0x38] sm:$0xff] }
   0xa   :  { %227 = vmatpush.msrb.mxu0 %v1947_v4  ;;  %353 = vmatpush.msrb.mxu1 %v1930_v0 }
   0xb   :  { %419 = vmatpush.msra.mxu2 %v1947_v4  ;;  %481 = vmatpush.msrb.mxu3 %v1930_v0 }
   0xc   :  { %228 = vmatpush.msrb.mxu0 %v1958_v6  ;;  %354 = vmatpush.msrb.mxu1 %v1935_v1 }
   0xd   :  { %420 = vmatpush.msra.mxu2 %v1958_v6  ;;  %482 = vmatpush.msrb.mxu3 %v1935_v1 }
   0xe   :  { %355 = vmatpush.msrb.mxu1 %v1947_v4  ;;  %1609 = vmatmul.msk.f32.gmra.mxu0 %vm66_vm0, %v53_v33 }
   0xf   :  { %609 = vmatpush.msrb.mxu2 %v1930_v0  ;;  %483 = vmatpush.msrb.mxu3 %v1947_v4 }
  0x10   :  { %356 = vmatpush.msrb.mxu1 %v1958_v6 }
  0x11   :  { %610 = vmatpush.msrb.mxu2 %v1935_v1  ;;  %484 = vmatpush.msrb.mxu3 %v1958_v6 }
  0x12   :  { %545 = vmatpush.msra.mxu1 %v1930_v0 }
  0x13   :  { %611 = vmatpush.msrb.mxu2 %v1947_v4 }
  0x14   :  { %546 = vmatpush.msra.mxu1 %v1935_v1 }
  0x15   :  { %612 = vmatpush.msrb.mxu2 %v1958_v6 }
  0x16   :  { %547 = vmatpush.msra.mxu1 %v1947_v4  ;;  %1610 = vmatmul.msk.f32.gmra.mxu0 %vm66_vm0, %v54_v34 }
  0x18   :  { %548 = vmatpush.msra.mxu1 %v1958_v6 }
  0x1e   :  { %1611 = vmatmul.msk.f32.gmra.mxu0 %vm66_vm0, %v55_v35 }
  0x26   :  { %1612 = vmatmul.msk.f32.gmra.mxu0 %vm66_vm0, %v56_v37 }
  0x2e   :  { %1613 = vmatmul.msk.f32.gmra.mxu0 %vm66_vm0, %v57_v43 }
  0x36   :  { %1614 = vmatmul.msk.f32.gmra.mxu0 %vm66_vm0, %v58_v44 }
  0x3e   :  { %1615 = vmatmul.msk.f32.gmra.mxu0 %vm66_vm0, %v59_v45 }
  0x82   :  { %v108_v12 = vpop.f32.mrf.mxu0 }
  0x83   :  { %v2009_v13 = vadd.f32 %v2006_v11, %v108_v12 }
  0x86   :  { %v163_v9 = vpop.f32.mrf.mxu1 }
  0x87   :  { %v164_v10 = vadd.f32 %v1999_v8, %v163_v9 }
  0x89   :  { %187 = vrot.lane.b32.xlu0 %v164_v10, %s1846_s29  ;;  %v166_v14 = vadd.f32 %v164_v10, %v2009_v13 }
  0x8b   :  { %v1617_v15 = vmul.f32 -1.442695, %v166_v14  ;;  %v111_v47 = vpop.f32.mrf.mxu0 }
  0x8c   :  { %v2060_v56 = vadd.f32 %v2006_v11, %v111_v47 }
  0x8d   :  { %1691 = vpow2.f32 %v1617_v15 }
  0x93   :  { %v1692_v16 = vpop.eup %1691  ;;  %v114_v48 = vpop.f32.mrf.mxu0 }
  0x94   :  { %v170_v17 = vadd.f32 1.0, %v1692_v16 }
  0x96   :  { %1693 = vrcp.f32 %v170_v17  ;;  %v182_v23 = vand.u32 2147483648, %v170_v17  ;;  %vm176_vm3 = vweird.f32 %v170_v17  ;;  %v180_v24 = vand.u32 2147483647, %v170_v17 }
  0x98   :  { %v183_v26 = vor.u32 1.1754944e-38, %v182_v23  ;;  %vm181_vm5 = vcmp.eq.f32.partialorder %v180_v24, 8.507059e+37 }
  0x9b   :  { %v2047_v49 = vpop.f32.mrf.mxu0 }
  0x9c   :  { %v1694_v18 = vpop.eup %1693 }
  0x9d   :  { %v172_v19 = vmul.f32 %v1694_v18, %v170_v17  ;;  %vm177_vm2 = vweird.f32 %v1694_v18 }
  0x9e   :  { %vm178_vm4 = vmor %vm176_vm3, %vm177_vm2 }
  0x9f   :  { %v173_v20 = vsub.f32 1.0, %v172_v19 }
  0xa1   :  { %v174_v21 = vmul.f32 %v1694_v18, %v173_v20 }
  0xa3   :  { %v175_v22 = vadd.f32 %v1694_v18, %v174_v21  ;;  %v2049_v50 = vpop.f32.mrf.mxu0 }
  0xa5   :  { %v179_v25 = vsel %vm178_vm4, %v1694_v18, %v175_v22 }
  0xa6   :  { %v184_v28 = vsel %vm181_vm5, %v183_v26, %v179_v25 }
  0xa7   :  { %v197_v38 = vsub.f32 1.0, %v184_v28 }
  0xab   :  { %v2051_v51 = vpop.f32.mrf.mxu0 }
  0xb3   :  { %v2053_v52 = vpop.f32.mrf.mxu0 }
  0xbb   :  { %v2055_v53 = vpop.f32.mrf.mxu0 }
  0xfb   :  { %v188_v27 = vpop.permute.xlu0 %187 }
  0xfc   :  { %v190_v29 = vmul.f32 %v188_v27, %v184_v28  ;;  %v2071_v27 = vadd.f32 %v2006_v11, %v114_v48 }
  0xfe   :  { %192 = vrot.lane.b32.xlu0 %v190_v29, %s1846_s29 }
 0x170   :  { %v193_v30 = vpop.permute.xlu0 %192 }
 0x171   :  { %v195_v31 = vadd.f32 %v193_v30, %v2009_v13 }
 0x173   :  { %1695 = vtanh.f32 %v195_v31 }
 0x179   :  { %v1696_v32 = vpop.eup %1695 }
 0x17a   :  { %199 = vrot.lane.b32.xlu1 %v1696_v32, %s1847_s5 }
 0x182   :  { %203 = vrot.lane.b32.xlu1 %v1966_v7, %s1848_s16 }
 0x1ec   :  { %v200_v36 = vpop.permute.xlu1 %199 }
 0x1ed   :  { %v202_v40 = vmul.f32 %v200_v36, %v197_v38 }
 0x1f4   :  { %v204_v39 = vpop.permute.xlu1 %203 }
 0x1f5   :  { %v206_v41 = vmul.f32 %v204_v39, %v184_v28 }
 0x1f7   :  { %v207_v42 = vadd.f32 %v206_v41, %v202_v40 }
 0x1f9   :  { %209 = vrot.lane.b32.xlu2 %v207_v42, %s1847_s5 }
 0x253   :  { %v210_v46 = vpop.permute.xlu2 %209 }
 0x254   :  { %1618 = vmatmul.msk.f32.vlgmr.msrb.gmra.mxu0 %vm142_vm1, %v210_v46 }
 0x2d1   :  { %v230_v54 = vpop.f32.mrf.mxu0 }
 0x2d2   :  { %v231_v55 = vadd.f32 %v1999_v8, %v230_v54 }
 0x2d4   :  { %254 = vrot.lane.b32.xlu2 %v231_v55, %s1846_s29  ;;  %v233_v57 = vadd.f32 %v231_v55, %v2060_v56 }
 0x2d6   :  { %v1619_v58 = vmul.f32 -1.442695, %v233_v57 }
 0x2d8   :  { %1697 = vpow2.f32 %v1619_v58 }
 0x2de   :  { %v1698_v59 = vpop.eup %1697 }
 0x2df   :  { %v237_v60 = vadd.f32 1.0, %v1698_v59 }
 0x2e1   :  { %1699 = vrcp.f32 %v237_v60  ;;  %v249_v5 = vand.u32 2147483648, %v237_v60  ;;  %vm243_vm7 = vweird.f32 %v237_v60  ;;  %v247_v7 = vand.u32 2147483647, %v237_v60 }
 0x2e3   :  { %v250_v10 = vor.u32 1.1754944e-38, %v249_v5  ;;  %vm248_vm9 = vcmp.eq.f32.partialorder %v247_v7, 8.507059e+37 }
 0x2e7   :  { %v1700_v61 = vpop.eup %1699 }
 0x2e8   :  { %v239_v62 = vmul.f32 %v1700_v61, %v237_v60  ;;  %vm244_vm6 = vweird.f32 %v1700_v61 }
 0x2e9   :  { %vm245_vm8 = vmor %vm243_vm7, %vm244_vm6 }
 0x2ea   :  { %v240_v63 = vsub.f32 1.0, %v239_v62 }
 0x2ec   :  { %v241_v2 = vmul.f32 %v1700_v61, %v240_v63 }
 0x2ee   :  { %v242_v3 = vadd.f32 %v1700_v61, %v241_v2 }
 0x2f0   :  { %v246_v9 = vsel %vm245_vm8, %v1700_v61, %v242_v3  ;;  %v2083_v61 = vadd.f32 %v2006_v11, %v2047_v49 }
 0x2f1   :  { %v251_v14 = vsel %vm248_vm9, %v250_v10, %v246_v9 }
 0x2f2   :  { %v264_v19 = vsub.f32 1.0, %v251_v14  ;;  %v270_v21 = vmul.f32 %v251_v14, %v207_v42 }
 0x32e   :  { %v255_v12 = vpop.permute.xlu2 %254 }
 0x32f   :  { %v257_v15 = vmul.f32 %v255_v12, %v251_v14 }
 0x331   :  { %259 = vrot.lane.b32.xlu0 %v257_v15, %s1846_s29 }
 0x3a3   :  { %v260_v16 = vpop.permute.xlu0 %259 }
 0x3a4   :  { %v262_v17 = vadd.f32 %v260_v16, %v2060_v56 }
 0x3a6   :  { %1701 = vtanh.f32 %v262_v17 }
 0x3ac   :  { %v1702_v18 = vpop.eup %1701 }
 0x3ad   :  { %266 = vrot.lane.b32.xlu1 %v1702_v18, %s1847_s5 }
 0x41f   :  { %v267_v20 = vpop.permute.xlu1 %266 }
 0x420   :  { %v269_v22 = vmul.f32 %v267_v20, %v264_v19 }
 0x422   :  { %v271_v23 = vadd.f32 %v270_v21, %v269_v22 }
 0x424   :  { %273 = vrot.lane.b32.xlu2 %v271_v23, %s1847_s5 }
 0x47e   :  { %v274_v24 = vpop.permute.xlu2 %273 }
 0x47f   :  { %1620 = vmatmul.msk.f32.vlgmr.msra.gmra.mxu3 %vm142_vm1, %v274_v24 }
 0x502   :  { %v294_v25 = vpop.f32.mrf.mxu3 }
 0x503   :  { %v295_v26 = vadd.f32 %v1999_v8, %v294_v25 }
 0x505   :  { %318 = vrot.lane.b32.xlu0 %v295_v26, %s1846_s29  ;;  %v297_v28 = vadd.f32 %v295_v26, %v2071_v27 }
 0x507   :  { %v1621_v29 = vmul.f32 -1.442695, %v297_v28 }
 0x509   :  { %1703 = vpow2.f32 %v1621_v29 }
 0x50f   :  { %v1704_v30 = vpop.eup %1703 }
 0x510   :  { %v301_v31 = vadd.f32 1.0, %v1704_v30 }
 0x512   :  { %1705 = vrcp.f32 %v301_v31  ;;  %v313_v37 = vand.u32 2147483648, %v301_v31  ;;  %vm307_vm11 = vweird.f32 %v301_v31  ;;  %v311_v38 = vand.u32 2147483647, %v301_v31 }
 0x514   :  { %v314_v40 = vor.u32 1.1754944e-38, %v313_v37  ;;  %vm312_vm13 = vcmp.eq.f32.partialorder %v311_v38, 8.507059e+37 }
 0x518   :  { %v1706_v32 = vpop.eup %1705 }
 0x519   :  { %v303_v33 = vmul.f32 %v1706_v32, %v301_v31  ;;  %vm308_vm10 = vweird.f32 %v1706_v32 }
 0x51a   :  { %vm309_vm12 = vmor %vm307_vm11, %vm308_vm10 }
 0x51b   :  { %v304_v34 = vsub.f32 1.0, %v303_v33 }
 0x51d   :  { %v305_v35 = vmul.f32 %v1706_v32, %v304_v34 }
 0x51f   :  { %v306_v36 = vadd.f32 %v1706_v32, %v305_v35 }
 0x521   :  { %v310_v39 = vsel %vm309_vm12, %v1706_v32, %v306_v36  ;;  %v2095_v32 = vadd.f32 %v2006_v11, %v2049_v50 }
 0x522   :  { %v315_v42 = vsel %vm312_vm13, %v314_v40, %v310_v39 }
 0x523   :  { %v328_v47 = vsub.f32 1.0, %v315_v42  ;;  %v334_v54 = vmul.f32 %v315_v42, %v271_v23 }
 0x577   :  { %v319_v41 = vpop.permute.xlu0 %318 }
 0x578   :  { %v321_v43 = vmul.f32 %v319_v41, %v315_v42 }
 0x57a   :  { %323 = vrot.lane.b32.xlu1 %v321_v43, %s1846_s29 }
 0x5ec   :  { %v324_v44 = vpop.permute.xlu1 %323 }
 0x5ed   :  { %v326_v45 = vadd.f32 %v324_v44, %v2071_v27 }
 0x5ef   :  { %1707 = vtanh.f32 %v326_v45 }
 0x5f5   :  { %v1708_v46 = vpop.eup %1707 }
 0x5f6   :  { %330 = vrot.lane.b32.xlu2 %v1708_v46, %s1847_s5 }
 0x650   :  { %v331_v48 = vpop.permute.xlu2 %330 }
 0x651   :  { %v333_v55 = vmul.f32 %v331_v48, %v328_v47 }
 0x653   :  { %v335_v57 = vadd.f32 %v334_v54, %v333_v55 }
 0x655   :  { %337 = vrot.lane.b32.xlu0 %v335_v57, %s1847_s5 }
 0x6c7   :  { %v338_v58 = vpop.permute.xlu0 %337 }
 0x6c8   :  { %1622 = vmatmul.msk.f32.vlgmr.msrb.gmra.mxu1 %vm142_vm1, %v338_v58 }
 0x745   :  { %v358_v59 = vpop.f32.mrf.mxu1 }
 0x746   :  { %v359_v60 = vadd.f32 %v1999_v8, %v358_v59 }
 0x748   :  { %382 = vrot.lane.b32.xlu1 %v359_v60, %s1846_s29  ;;  %v361_v62 = vadd.f32 %v359_v60, %v2083_v61 }
 0x74a   :  { %v1623_v63 = vmul.f32 -1.442695, %v361_v62 }
 0x74c   :  { %1709 = vpow2.f32 %v1623_v63 }
 0x752   :  { %v1710_v2 = vpop.eup %1709 }
 0x753   :  { %v365_v3 = vadd.f32 1.0, %v1710_v2 }
 0x755   :  { %1711 = vrcp.f32 %v365_v3  ;;  %v377_v14 = vand.u32 2147483648, %v365_v3  ;;  %vm371_vm15 = vweird.f32 %v365_v3  ;;  %v375_v15 = vand.u32 2147483647, %v365_v3 }
 0x757   :  { %v378_v49 = vor.u32 1.1754944e-38, %v377_v14  ;;  %vm376_vm3 = vcmp.eq.f32.partialorder %v375_v15, 8.507059e+37 }
 0x75b   :  { %v1712_v5 = vpop.eup %1711 }
 0x75c   :  { %v367_v7 = vmul.f32 %v1712_v5, %v365_v3  ;;  %vm372_vm14 = vweird.f32 %v1712_v5 }
 0x75d   :  { %vm373_vm2 = vmor %vm371_vm15, %vm372_vm14 }
 0x75e   :  { %v368_v9 = vsub.f32 1.0, %v367_v7 }
 0x760   :  { %v369_v10 = vmul.f32 %v1712_v5, %v368_v9 }
 0x762   :  { %v370_v12 = vadd.f32 %v1712_v5, %v369_v10 }
 0x764   :  { %v374_v16 = vsel %vm373_vm2, %v1712_v5, %v370_v12  ;;  %v2107_v5 = vadd.f32 %v2006_v11, %v2051_v51 }
 0x765   :  { %v379_v18 = vsel %vm376_vm3, %v378_v49, %v374_v16 }
 0x766   :  { %v392_v23 = vsub.f32 1.0, %v379_v18  ;;  %v398_v25 = vmul.f32 %v379_v18, %v335_v57 }
 0x7ba   :  { %v383_v17 = vpop.permute.xlu1 %382 }
 0x7bb   :  { %v385_v19 = vmul.f32 %v383_v17, %v379_v18 }
 0x7bd   :  { %387 = vrot.lane.b32.xlu2 %v385_v19, %s1846_s29 }
 0x817   :  { %v388_v20 = vpop.permute.xlu2 %387 }
 0x818   :  { %v390_v21 = vadd.f32 %v388_v20, %v2083_v61 }
 0x81a   :  { %1713 = vtanh.f32 %v390_v21 }
 0x820   :  { %v1714_v22 = vpop.eup %1713 }
 0x821   :  { %394 = vrot.lane.b32.xlu0 %v1714_v22, %s1847_s5 }
 0x893   :  { %v395_v24 = vpop.permute.xlu0 %394 }
 0x894   :  { %v397_v26 = vmul.f32 %v395_v24, %v392_v23 }
 0x896   :  { %v399_v28 = vadd.f32 %v398_v25, %v397_v26 }
 0x898   :  { %401 = vrot.lane.b32.xlu1 %v399_v28, %s1847_s5 }
 0x90a   :  { %v402_v29 = vpop.permute.xlu1 %401 }
 0x90b   :  { %1624 = vmatmul.msk.f32.vlgmr.msra.gmra.mxu2 %vm142_vm1, %v402_v29 }
 0x98e   :  { %v422_v30 = vpop.f32.mrf.mxu2 }
 0x98f   :  { %v423_v31 = vadd.f32 %v1999_v8, %v422_v30 }
 0x991   :  { %446 = vrot.lane.b32.xlu2 %v423_v31, %s1846_s29  ;;  %v425_v33 = vadd.f32 %v423_v31, %v2095_v32 }
 0x993   :  { %v1625_v34 = vmul.f32 -1.442695, %v425_v33 }
 0x995   :  { %1715 = vpow2.f32 %v1625_v34 }
 0x99b   :  { %v1716_v35 = vpop.eup %1715 }
 0x99c   :  { %v429_v36 = vadd.f32 1.0, %v1716_v35 }
 0x99e   :  { %1717 = vrcp.f32 %v429_v36  ;;  %v441_v42 = vand.u32 2147483648, %v429_v36  ;;  %vm435_vm5 = vweird.f32 %v429_v36  ;;  %v439_v43 = vand.u32 2147483647, %v429_v36 }
 0x9a0   :  { %v442_v50 = vor.u32 1.1754944e-38, %v441_v42  ;;  %vm440_vm7 = vcmp.eq.f32.partialorder %v439_v43, 8.507059e+37 }
 0x9a4   :  { %v1718_v37 = vpop.eup %1717 }
 0x9a5   :  { %v431_v38 = vmul.f32 %v1718_v37, %v429_v36  ;;  %vm436_vm4 = vweird.f32 %v1718_v37 }
 0x9a6   :  { %vm437_vm6 = vmor %vm435_vm5, %vm436_vm4 }
 0x9a7   :  { %v432_v39 = vsub.f32 1.0, %v431_v38 }
 0x9a9   :  { %v433_v40 = vmul.f32 %v1718_v37, %v432_v39 }
 0x9ab   :  { %v434_v41 = vadd.f32 %v1718_v37, %v433_v40 }
 0x9ad   :  { %v438_v44 = vsel %vm437_vm6, %v1718_v37, %v434_v41  ;;  %v2119_v37 = vadd.f32 %v2006_v11, %v2053_v52  ;;  %vm714_vm6 = vcmask 64512  }
 0x9ae   :  { %v443_v46 = vsel %vm440_vm7, %v442_v50, %v438_v44 }
 0x9af   :  { %v456_v57 = vsub.f32 1.0, %v443_v46  ;;  %v462_v59 = vmul.f32 %v443_v46, %v399_v28 }
 0x9eb   :  { %v447_v45 = vpop.permute.xlu2 %446 }
 0x9ec   :  { %v449_v47 = vmul.f32 %v447_v45, %v443_v46 }
 0x9ee   :  { %451 = vrot.lane.b32.xlu0 %v449_v47, %s1846_s29 }
 0xa60   :  { %v452_v48 = vpop.permute.xlu0 %451 }
 0xa61   :  { %v454_v54 = vadd.f32 %v452_v48, %v2095_v32 }
 0xa63   :  { %1719 = vtanh.f32 %v454_v54 }
 0xa69   :  { %v1720_v55 = vpop.eup %1719 }
 0xa6a   :  { %458 = vrot.lane.b32.xlu1 %v1720_v55, %s1847_s5 }
 0xadc   :  { %v459_v58 = vpop.permute.xlu1 %458 }
 0xadd   :  { %v461_v60 = vmul.f32 %v459_v58, %v456_v57 }
 0xadf   :  { %v463_v62 = vadd.f32 %v462_v59, %v461_v60 }
 0xae1   :  { %465 = vrot.lane.b32.xlu2 %v463_v62, %s1847_s5 }
 0xb3b   :  { %v466_v63 = vpop.permute.xlu2 %465 }
 0xb3c   :  { %1626 = vmatmul.msk.f32.vlgmr.msrb.gmra.mxu3 %vm142_vm1, %v466_v63 }
 0xbbf   :  { %v486_v2 = vpop.f32.mrf.mxu3 }
 0xbc0   :  { %v487_v3 = vadd.f32 %v1999_v8, %v486_v2 }
 0xbc2   :  { %510 = vrot.lane.b32.xlu0 %v487_v3, %s1846_s29  ;;  %v489_v7 = vadd.f32 %v487_v3, %v2107_v5 }
 0xbc4   :  { %v1627_v9 = vmul.f32 -1.442695, %v489_v7 }
 0xbc6   :  { %1721 = vpow2.f32 %v1627_v9 }
 0xbcc   :  { %v1722_v10 = vpop.eup %1721 }
 0xbcd   :  { %v493_v12 = vadd.f32 1.0, %v1722_v10 }
 0xbcf   :  { %1723 = vrcp.f32 %v493_v12  ;;  %v505_v18 = vand.u32 2147483648, %v493_v12  ;;  %vm499_vm9 = vweird.f32 %v493_v12  ;;  %v503_v19 = vand.u32 2147483647, %v493_v12 }
 0xbd1   :  { %v506_v51 = vor.u32 1.1754944e-38, %v505_v18  ;;  %vm504_vm11 = vcmp.eq.f32.partialorder %v503_v19, 8.507059e+37 }
 0xbd5   :  { %v1724_v14 = vpop.eup %1723 }
 0xbd6   :  { %v495_v15 = vmul.f32 %v1724_v14, %v493_v12  ;;  %vm500_vm8 = vweird.f32 %v1724_v14 }
 0xbd7   :  { %vm501_vm10 = vmor %vm499_vm9, %vm500_vm8 }
 0xbd8   :  { %v496_v16 = vsub.f32 1.0, %v495_v15 }
 0xbda   :  { %v497_v49 = vmul.f32 %v1724_v14, %v496_v16 }
 0xbdc   :  { %v498_v17 = vadd.f32 %v1724_v14, %v497_v49 }
 0xbde   :  { %v502_v20 = vsel %vm501_vm10, %v1724_v14, %v498_v17  ;;  %v2131_v14 = vadd.f32 %v2006_v11, %v2055_v53 }
 0xbdf   :  { %v507_v22 = vsel %vm504_vm11, %v506_v51, %v502_v20 }
 0xbe0   :  { %v520_v28 = vsub.f32 1.0, %v507_v22  ;;  %v526_v30 = vmul.f32 %v507_v22, %v463_v62 }
 0xc34   :  { %v511_v21 = vpop.permute.xlu0 %510 }
 0xc35   :  { %v513_v23 = vmul.f32 %v511_v21, %v507_v22 }
 0xc37   :  { %515 = vrot.lane.b32.xlu1 %v513_v23, %s1846_s29 }
 0xca9   :  { %v516_v24 = vpop.permute.xlu1 %515 }
 0xcaa   :  { %v518_v25 = vadd.f32 %v516_v24, %v2107_v5 }
 0xcac   :  { %1725 = vtanh.f32 %v518_v25 }
 0xcb2   :  { %v1726_v26 = vpop.eup %1725 }
 0xcb3   :  { %522 = vrot.lane.b32.xlu2 %v1726_v26, %s1847_s5 }
 0xd0d   :  { %v523_v29 = vpop.permute.xlu2 %522 }
 0xd0e   :  { %v525_v31 = vmul.f32 %v523_v29, %v520_v28 }
 0xd10   :  { %v527_v33 = vadd.f32 %v526_v30, %v525_v31  ;;  %v2140_v31 = vld [vmem:[%s2449_s7 + $0x18] sm:$0xff] }
 0xd11   :  { %676 = vmatpush.msra.mxu3 %v2140_v31 }
 0xd12   :  { %529 = vrot.lane.b32.xlu0 %v527_v33, %s1847_s5 }
 0xd84   :  { %v530_v34 = vpop.permute.xlu0 %529 }
 0xd85   :  { %1628 = vmatmul.msk.f32.vlgmr.msra.gmra.mxu1 %vm142_vm1, %v530_v34  ;;  %v2151_v34 = vld [vmem:[%s2449_s7 + $0x8] sm:$0xff] }
 0xe02   :  { %v550_v35 = vpop.f32.mrf.mxu1 }
 0xe03   :  { %v551_v36 = vadd.f32 %v1999_v8, %v550_v35  ;;  %v2157_v35 = vld [vmem:[%s2449_s7] sm:$0xff] }
 0xe05   :  { %574 = vrot.lane.b32.xlu1 %v551_v36, %s1846_s29  ;;  %v553_v38 = vadd.f32 %v551_v36, %v2119_v37 }
 0xe07   :  { %v1629_v39 = vmul.f32 -1.442695, %v553_v38 }
 0xe09   :  { %1727 = vpow2.f32 %v1629_v39 }
 0xe0f   :  { %v1728_v40 = vpop.eup %1727 }
 0xe10   :  { %v557_v41 = vadd.f32 1.0, %v1728_v40 }
 0xe12   :  { %1729 = vrcp.f32 %v557_v41  ;;  %v569_v46 = vand.u32 2147483648, %v557_v41  ;;  %vm563_vm13 = vweird.f32 %v557_v41  ;;  %v567_v47 = vand.u32 2147483647, %v557_v41 }
 0xe14   :  { %v570_v52 = vor.u32 1.1754944e-38, %v569_v46  ;;  %vm568_vm15 = vcmp.eq.f32.partialorder %v567_v47, 8.507059e+37 }
 0xe18   :  { %v1730_v42 = vpop.eup %1729 }
 0xe19   :  { %v559_v43 = vmul.f32 %v1730_v42, %v557_v41  ;;  %vm564_vm12 = vweird.f32 %v1730_v42 }
 0xe1a   :  { %vm565_vm14 = vmor %vm563_vm13, %vm564_vm12 }
 0xe1b   :  { %v560_v44 = vsub.f32 1.0, %v559_v43  ;;  %v2174_v43 = vld [vmem:[%s2450_s8] ss:$0 sm:$0xff]  ;;  %s1597_s8 = sshll.u32 %s2456_s14, 4  ;;  %s1598_s8 = int_to_ptr.hbm [resolvable:$true] %s1597_s8 }
 0xe1d   :  { %v561_v50 = vmul.f32 %v1730_v42, %v560_v44 }
 0xe1f   :  { %v562_v45 = vadd.f32 %v1730_v42, %v561_v50 }
 0xe21   :  { %v566_v48 = vsel %vm565_vm14, %v1730_v42, %v562_v45 }
 0xe22   :  { %v571_v55 = vsel %vm568_vm15, %v570_v52, %v566_v48  ;;  %v2196_v52 = vld [vmem:[%s2444_s2] sm:$0xff]  ;;  %s1850_s2 = smov 16  }
 0xe23   :  { %v584_v62 = vsub.f32 1.0, %v571_v55  ;;  %v590_v2 = vmul.f32 %v571_v55, %v527_v33  ;;  %v2145_v33 = vld [vmem:[%s2449_s7 + $0x10] sm:$0xff]  ;;  %s1851_s7 = smov [#allocation3]  }
 0xe24   :  { %677 = vmatpush.msra.mxu3 %v2145_v33 }
 0xe26   :  { %678 = vmatpush.msra.mxu3 %v2151_v34 }
 0xe28   :  { %679 = vmatpush.msra.mxu3 %v2157_v35 }
 0xe2a   :  { %785 = vmatpush.msrb.mxu3 %v1930_v0 }
 0xe2c   :  { %786 = vmatpush.msrb.mxu3 %v1935_v1 }
 0xe2e   :  { %787 = vmatpush.msrb.mxu3 %v1947_v4 }
 0xe30   :  { %788 = vmatpush.msrb.mxu3 %v1958_v6 }
 0xe77   :  { %v575_v54 = vpop.permute.xlu1 %574 }
 0xe78   :  { %v577_v57 = vmul.f32 %v575_v54, %v571_v55 }
 0xe7a   :  { %579 = vrot.lane.b32.xlu2 %v577_v57, %s1846_s29 }
 0xed4   :  { %v580_v58 = vpop.permute.xlu2 %579 }
 0xed5   :  { %v582_v59 = vadd.f32 %v580_v58, %v2119_v37 }
 0xed7   :  { %1731 = vtanh.f32 %v582_v59 }
 0xedd   :  { %v1732_v60 = vpop.eup %1731 }
 0xede   :  { %586 = vrot.lane.b32.xlu0 %v1732_v60, %s1847_s5 }
 0xf50   :  { %v587_v63 = vpop.permute.xlu0 %586 }
 0xf51   :  { %v589_v3 = vmul.f32 %v587_v63, %v584_v62 }
 0xf53   :  { %v591_v7 = vadd.f32 %v590_v2, %v589_v3 }
 0xf55   :  { %593 = vrot.lane.b32.xlu1 %v591_v7, %s1847_s5 }
 0xfc7   :  { %v594_v9 = vpop.permute.xlu1 %593 }
 0xfc8   :  { %1630 = vmatmul.msk.f32.vlgmr.msrb.gmra.mxu2 %vm142_vm1, %v594_v9 }
0x104b   :  { %v614_v10 = vpop.f32.mrf.mxu2 }
0x104c   :  { %v615_v12 = vadd.f32 %v1999_v8, %v614_v10 }
0x104e   :  { %638 = vrot.lane.b32.xlu2 %v615_v12, %s1846_s29  ;;  %v617_v15 = vadd.f32 %v615_v12, %v2131_v14 }
0x1050   :  { %v1631_v16 = vmul.f32 -1.442695, %v617_v15 }
0x1052   :  { %1733 = vpow2.f32 %v1631_v16 }
0x1058   :  { %v1734_v49 = vpop.eup %1733 }
0x1059   :  { %v621_v17 = vadd.f32 1.0, %v1734_v49 }
0x105b   :  { %1735 = vrcp.f32 %v621_v17  ;;  %v633_v22 = vand.u32 2147483648, %v621_v17  ;;  %vm627_vm3 = vweird.f32 %v621_v17  ;;  %v631_v23 = vand.u32 2147483647, %v621_v17 }
0x105d   :  { %v634_v11 = vor.u32 1.1754944e-38, %v633_v22  ;;  %vm632_vm5 = vcmp.eq.f32.partialorder %v631_v23, 8.507059e+37 }
0x1061   :  { %v1736_v18 = vpop.eup %1735 }
0x1062   :  { %v623_v19 = vmul.f32 %v1736_v18, %v621_v17  ;;  %vm628_vm2 = vweird.f32 %v1736_v18 }
0x1063   :  { %vm629_vm4 = vmor %vm627_vm3, %vm628_vm2 }
0x1064   :  { %v624_v20 = vsub.f32 1.0, %v623_v19 }
0x1066   :  { %v625_v51 = vmul.f32 %v1736_v18, %v624_v20 }
0x1068   :  { %v626_v21 = vadd.f32 %v1736_v18, %v625_v51 }
0x106a   :  { %v630_v24 = vsel %vm629_vm4, %v1736_v18, %v626_v21 }
0x106b   :  { %v635_v25 = vsel %vm632_vm5, %v634_v11, %v630_v24 }
0x106c   :  { %v648_v36 = vsub.f32 1.0, %v635_v25  ;;  %v654_v39 = vmul.f32 %v635_v25, %v591_v7 }
0x10a8   :  { %v639_v53 = vpop.permute.xlu2 %638 }
0x10a9   :  { %v641_v26 = vmul.f32 %v639_v53, %v635_v25 }
0x10ab   :  { %643 = vrot.lane.b32.xlu0 %v641_v26, %s1846_s29 }
0x111d   :  { %v644_v28 = vpop.permute.xlu0 %643 }
0x111e   :  { %v646_v29 = vadd.f32 %v644_v28, %v2131_v14 }
0x1120   :  { %1737 = vtanh.f32 %v646_v29 }
0x1126   :  { %v1738_v30 = vpop.eup %1737 }
0x1127   :  { %650 = vrot.lane.b32.xlu1 %v1738_v30, %s1847_s5 }
0x1199   :  { %v651_v38 = vpop.permute.xlu1 %650 }
0x119a   :  { %v653_v40 = vmul.f32 %v651_v38, %v648_v36 }
0x119c   :  { %v655_v41 = vadd.f32 %v654_v39, %v653_v40 }
0x119e   :  { %660 = vrot.lane.b32.xlu2 %v655_v41, %s1847_s5 }
0x11f8   :  { %v661_v42 = vpop.permute.xlu2 %660 }
0x11f9   :  { %1632 = vmatmul.msk.f32.vlgmr.msra.gmra.mxu3 %vm142_vm1, %v661_v42 }
0x11fa   :  { %986 = vmatpush.msra.mxu3 %v1930_v0 }
0x11fc   :  { %987 = vmatpush.msra.mxu3 %v1935_v1 }
0x11fe   :  { %988 = vmatpush.msra.mxu3 %v1947_v4 }
0x1200   :  { %989 = vmatpush.msra.mxu3 %v1958_v6 }
0x127c   :  { %v681_v44 = vpop.f32.mrf.mxu3 }
0x127d   :  { %v682_v50 = vadd.f32 %v2174_v43, %v681_v44 }
0x127f   :  { %1739 = vtanh.f32 %v682_v50 }
0x1285   :  { %v1740_v45 = vpop.eup %1739 }
0x1286   :  { %686 = vrot.lane.b32.xlu0 %v1740_v45, %s1849_s23 }
0x128e   :  { %739 = vrot.lane.b32.xlu0 %v1740_v45, %s1847_s5 }
0x12f8   :  { %v687_v46 = vpop.permute.xlu0 %686 }
0x12f9   :  { %1633 = vmatpush.xpose.msk.msrb.mxu1 %vm66_vm0, %v687_v46 }
0x12fc   :  { %1634 = vmatmul.msk.f32.vlgmr.msrb.gmra.mxu1 %vm66_vm0, %v1740_v45 }
0x12fd   :  { %854 = vmatpush.msra.mxu1 %v1930_v0 }
0x12ff   :  { %855 = vmatpush.msra.mxu1 %v1935_v1 }
0x1300   :  { %v740_v47 = vpop.permute.xlu0 %739 }
0x1301   :  { %856 = vmatpush.msra.mxu1 %v1947_v4  ;;  %760 = vmatpush.msra.mxu2 %v740_v47 }
0x1303   :  { %857 = vmatpush.msra.mxu1 %v1958_v6  ;;  %920 = vmatpush.msrb.mxu2 %v1930_v0 }
0x1305   :  { %1052 = vmatpush.msrb.mxu1 %v1930_v0  ;;  %921 = vmatpush.msrb.mxu2 %v1935_v1 }
0x1307   :  { %1053 = vmatpush.msrb.mxu1 %v1935_v1  ;;  %922 = vmatpush.msrb.mxu2 %v1947_v4 }
0x1309   :  { %1054 = vmatpush.msrb.mxu1 %v1947_v4  ;;  %923 = vmatpush.msrb.mxu2 %v1958_v6 }
0x130b   :  { %1055 = vmatpush.msrb.mxu1 %v1958_v6 }
0x1379   :  { %v709_v48 = vpop.f32.mrf.mxu1 }
0x137a   :  { %v712_v54 = vmul.f32 0.25, %v709_v48 }
0x137c   :  { %v713_v55 = vadd.f32 %v712_v54, %v2196_v52 }
0x137e   :  { %v715_v57 = vsel %vm714_vm6, %v713_v55, -inf }
0x137f   :  { %716 = vmax.xlane.f32.xlu1 %v715_v57  ;;  %v2235_v57 = vld [vmem:[%s2451_s9 + $0x8] sm:$0xff] }
0x13f2   :  { %v717_v58 = vpop.xlane.xlu1 %716 }
0x13f3   :  { %v718_v59 = vsub.f32 %v713_v55, %v717_v58  ;;  %v2224_v55 = vld [vmem:[%s2451_s9 + $0x18] sm:$0xff]  ;;  %v2241_v58 = vld [vmem:[%s2451_s9] sm:$0xff] }
0x13f4   :  { %1462 = vmatpush.msra.mxu0 %v2224_v55 }
0x13f5   :  { %v719_v60 = vmul.f32 1.442695, %v718_v59 }
0x13f7   :  { %1741 = vpow2.f32 %v719_v60  ;;  %v1815_v60 = vld [vmem:[%s2446_s4 + $0x18] sm:$0xff] }
0x13fd   :  { %v1742_v62 = vpop.eup %1741 }
0x13fe   :  { %v721_v63 = vsel %vm714_vm6, %v1742_v62, 0.0 }
0x13ff   :  { %722 = vadd.xlane.f32.xlu2 %v721_v63  ;;  %v1817_v63 = vld [vmem:[%s2446_s4 + $0x8] sm:$0xff] }
0x1472   :  { %v723_v2 = vpop.xlane.xlu2 %722 }
0x1473   :  { %1743 = vrcp.f32 %v723_v2  ;;  %v735_v10 = vand.u32 2147483648, %v723_v2  ;;  %v733_v15 = vand.u32 2147483647, %v723_v2  ;;  %vm729_vm8 = vweird.f32 %v723_v2 }
0x1475   :  { %v736_v49 = vor.u32 1.1754944e-38, %v735_v10  ;;  %vm734_vm10 = vcmp.eq.f32.partialorder %v733_v15, 8.507059e+37 }
0x1479   :  { %v1744_v3 = vpop.eup %1743 }
0x147a   :  { %v725_v7 = vmul.f32 %v1744_v3, %v723_v2  ;;  %vm730_vm7 = vweird.f32 %v1744_v3 }
0x147b   :  { %vm731_vm9 = vmor %vm729_vm8, %vm730_vm7 }
0x147c   :  { %v726_v9 = vsub.f32 1.0, %v725_v7 }
0x147e   :  { %v727_v12 = vmul.f32 %v1744_v3, %v726_v9 }
0x1480   :  { %v728_v16 = vadd.f32 %v1744_v3, %v727_v12 }
0x1482   :  { %v732_v17 = vsel %vm731_vm9, %v1744_v3, %v728_v16  ;;  %v1818_v3 = vld [vmem:[%s2446_s4] sm:$0xff] }
0x1483   :  { %v737_v18 = vsel %vm734_vm10, %v736_v49, %v732_v17 }
0x1484   :  { %v738_v19 = vmul.f32 %v1742_v62, %v737_v18  ;;  %v1816_v62 = vld [vmem:[%s2446_s4 + $0x10] sm:$0xff] }
0x1486   :  { %1635 = vmatmul.msk.f32.vlgmr.msra.gmra.mxu2 %vm714_vm6, %v738_v19 }
0x1487   :  { %1118 = vmatpush.msra.mxu2 %v1930_v0 }
0x1489   :  { %1119 = vmatpush.msra.mxu2 %v1935_v1 }
0x148b   :  { %1120 = vmatpush.msra.mxu2 %v1947_v4 }
0x148d   :  { %1121 = vmatpush.msra.mxu2 %v1958_v6 }
0x1509   :  { %v762_v20 = vpop.f32.mrf.mxu2 }
0x150a   :  { %766 = vrot.lane.b32.xlu0 %v762_v20, %s1850_s2 }
0x157c   :  { %v767_v51 = vpop.permute.xlu0 %766 }
0x157d   :  { %v769_v21 = vsel %vm66_vm0, %v1740_v45, %v767_v51 }
0x157e   :  { %830 = vrot.lane.b32.xlu2 %v769_v21, %s1848_s16  ;;  %1636 = vmatmul.msk.f32.vlgmr.msrb.gmra.mxu3 %vm142_vm1, %v769_v21 }
0x157f   :  { %1184 = vmatpush.msrb.mxu3 %v1930_v0 }
0x1581   :  { %1185 = vmatpush.msrb.mxu3 %v1935_v1 }
0x1583   :  { %1186 = vmatpush.msrb.mxu3 %v1947_v4 }
0x1585   :  { %1187 = vmatpush.msrb.mxu3 %v1958_v6 }
0x15d8   :  { %v831_v45 = vpop.permute.xlu2 %830 }
0x1601   :  { %v790_v22 = vpop.f32.mrf.mxu3 }
0x1602   :  { %v791_v23 = vadd.f32 %v1999_v8, %v790_v22 }
0x1604   :  { %814 = vrot.lane.b32.xlu0 %v791_v23, %s1846_s29  ;;  %v793_v24 = vadd.f32 %v791_v23, %v2009_v13 }
0x1606   :  { %v1637_v11 = vmul.f32 -1.442695, %v793_v24 }
0x1608   :  { %1745 = vpow2.f32 %v1637_v11 }
0x160e   :  { %v1746_v53 = vpop.eup %1745 }
0x160f   :  { %v797_v25 = vadd.f32 1.0, %v1746_v53 }
0x1611   :  { %1747 = vrcp.f32 %v797_v25  ;;  %v809_v4 = vand.u32 2147483648, %v797_v25  ;;  %vm803_vm12 = vweird.f32 %v797_v25  ;;  %v807_v6 = vand.u32 2147483647, %v797_v25 }
0x1613   :  { %v810_v36 = vor.u32 1.1754944e-38, %v809_v4  ;;  %vm808_vm14 = vcmp.eq.f32.partialorder %v807_v6, 8.507059e+37 }
0x1617   :  { %v1748_v26 = vpop.eup %1747 }
0x1618   :  { %v799_v0 = vmul.f32 %v1748_v26, %v797_v25  ;;  %vm804_vm11 = vweird.f32 %v1748_v26 }
0x1619   :  { %vm805_vm13 = vmor %vm803_vm12, %vm804_vm11 }
0x161a   :  { %v800_v28 = vsub.f32 1.0, %v799_v0 }
0x161c   :  { %v801_v1 = vmul.f32 %v1748_v26, %v800_v28 }
0x161e   :  { %v802_v29 = vadd.f32 %v1748_v26, %v801_v1 }
0x1620   :  { %v806_v30 = vsel %vm805_vm13, %v1748_v26, %v802_v29 }
0x1621   :  { %v811_v39 = vsel %vm808_vm14, %v810_v36, %v806_v30  ;;  %v2277_v36 = vld [vmem:[%s2448_s6] ss:$0 sm:$0xff]  ;;  %s1595_s6 = sshll.u32 %s1851_s7, 4  ;;  %s1596_s6 = int_to_ptr.vmem [resolvable:$true] %s1595_s6 }
0x1622   :  { %v824_v50 = vsub.f32 1.0, %v811_v39  ;;  %v833_v47 = vmul.f32 %v831_v45, %v811_v39 }
0x1676   :  { %v815_v38 = vpop.permute.xlu0 %814 }
0x1677   :  { %v817_v40 = vmul.f32 %v815_v38, %v811_v39 }
0x1679   :  { %819 = vrot.lane.b32.xlu0 %v817_v40, %s1846_s29 }
0x16eb   :  { %v820_v41 = vpop.permute.xlu0 %819 }
0x16ec   :  { %v822_v42 = vadd.f32 %v820_v41, %v2009_v13  ;;  %v2229_v13 = vld [vmem:[%s2451_s9 + $0x10] sm:$0xff] }
0x16ed   :  { %1463 = vmatpush.msra.mxu0 %v2229_v13 }
0x16ee   :  { %1749 = vtanh.f32 %v822_v42 }
0x16ef   :  { %1464 = vmatpush.msra.mxu0 %v2235_v57 }
0x16f1   :  { %1465 = vmatpush.msra.mxu0 %v2241_v58 }
0x16f4   :  { %v1750_v44 = vpop.eup %1749 }
0x16f5   :  { %826 = vrot.lane.b32.xlu0 %v1750_v44, %s1847_s5 }
0x1767   :  { %v827_v46 = vpop.permute.xlu0 %826 }
0x1768   :  { %v829_v48 = vmul.f32 %v827_v46, %v824_v50 }
0x176a   :  { %v834_v54 = vadd.f32 %v833_v47, %v829_v48 }
0x176c   :  { %836 = vrot.lane.b32.xlu1 %v834_v54, %s1847_s5 }
0x17de   :  { %v837_v59 = vpop.permute.xlu1 %836 }
0x17df   :  { %839 = vst.msk [vmem:[#allocation2] sm:$0xff] %vm142_vm1, %v837_v59  ;;  %1638 = vmatmul.msk.f32.vlgmr.msra.gmra.mxu1 %vm142_vm1, %v837_v59 }
0x17e0   :  { %1250 = vmatpush.msra.mxu1 %v1815_v60 }
0x17e2   :  { %1251 = vmatpush.msra.mxu1 %v1816_v62 }
0x17e4   :  { %1252 = vmatpush.msra.mxu1 %v1817_v63 }
0x17e6   :  { %v1410_v2 = vld [vmem:[#allocation2] sm:$0xff]  ;;  %1253 = vmatpush.msra.mxu1 %v1818_v3 }
0x17e7   :  { %1656 = vmatmul.msk.f32.vlgmr.msra.gmra.mxu0 %vm142_vm1, %v1410_v2 }
0x185c   :  { %v859_v7 = vpop.f32.mrf.mxu1 }
0x185d   :  { %v860_v9 = vadd.f32 %v1999_v8, %v859_v7 }
0x185f   :  { %883 = vrot.lane.b32.xlu0 %v860_v9, %s1846_s29  ;;  %v862_v10 = vadd.f32 %v860_v9, %v2060_v56 }
0x1861   :  { %v1639_v12 = vmul.f32 -1.442695, %v862_v10 }
0x1863   :  { %1751 = vpow2.f32 %v1639_v12 }
0x1869   :  { %v1752_v15 = vpop.eup %1751 }
0x186a   :  { %v866_v16 = vadd.f32 1.0, %v1752_v15 }
0x186c   :  { %1753 = vrcp.f32 %v866_v16  ;;  %v878_v51 = vand.u32 2147483648, %v866_v16  ;;  %vm872_vm2 = vweird.f32 %v866_v16  ;;  %v876_v21 = vand.u32 2147483647, %v866_v16 }
0x186e   :  { %v879_v22 = vor.u32 1.1754944e-38, %v878_v51  ;;  %vm877_vm4 = vcmp.eq.f32.partialorder %v876_v21, 8.507059e+37 }
0x1872   :  { %v1754_v49 = vpop.eup %1753 }
0x1873   :  { %v868_v17 = vmul.f32 %v1754_v49, %v866_v16  ;;  %vm873_vm15 = vweird.f32 %v1754_v49 }
0x1874   :  { %vm874_vm3 = vmor %vm872_vm2, %vm873_vm15 }
0x1875   :  { %v869_v18 = vsub.f32 1.0, %v868_v17 }
0x1877   :  { %v870_v19 = vmul.f32 %v1754_v49, %v869_v18 }
0x1879   :  { %v871_v20 = vadd.f32 %v1754_v49, %v870_v19 }
0x187b   :  { %v875_v8 = vsel %vm874_vm3, %v1754_v49, %v871_v20 }
0x187c   :  { %v880_v24 = vsel %vm877_vm4, %v879_v22, %v875_v8 }
0x187d   :  { %v893_v0 = vsub.f32 1.0, %v880_v24  ;;  %v899_v1 = vmul.f32 %v880_v24, %v834_v54 }
0x18d1   :  { %v884_v23 = vpop.permute.xlu0 %883 }
0x18d2   :  { %v886_v11 = vmul.f32 %v884_v23, %v880_v24 }
0x18d4   :  { %888 = vrot.lane.b32.xlu0 %v886_v11, %s1846_s29 }
0x1946   :  { %v889_v53 = vpop.permute.xlu0 %888 }
0x1947   :  { %v891_v25 = vadd.f32 %v889_v53, %v2060_v56 }
0x1949   :  { %1755 = vtanh.f32 %v891_v25 }
0x194f   :  { %v1756_v26 = vpop.eup %1755 }
0x1950   :  { %895 = vrot.lane.b32.xlu0 %v1756_v26, %s1847_s5 }
0x19c2   :  { %v896_v28 = vpop.permute.xlu0 %895 }
0x19c3   :  { %v898_v29 = vmul.f32 %v896_v28, %v893_v0 }
0x19c5   :  { %v900_v4 = vadd.f32 %v899_v1, %v898_v29 }
0x19c7   :  { %902 = vrot.lane.b32.xlu2 %v900_v4, %s1847_s5 }
0x1a21   :  { %v903_v6 = vpop.permute.xlu2 %902 }
0x1a22   :  { %905 = vst.msk [vmem:[#allocation2 + $0x8] sm:$0xff] %vm142_vm1, %v903_v6  ;;  %1640 = vmatmul.msk.f32.vlgmr.msrb.gmra.mxu2 %vm142_vm1, %v903_v6 }
0x1a23   :  { %1316 = vmatpush.msrb.mxu2 %v2140_v31 }
0x1a25   :  { %1317 = vmatpush.msrb.mxu2 %v2145_v33 }
0x1a27   :  { %1318 = vmatpush.msrb.mxu2 %v2151_v34 }
0x1a29   :  { %v1411_v56 = vld [vmem:[#allocation2 + $0x8] sm:$0xff]  ;;  %1319 = vmatpush.msrb.mxu2 %v2157_v35 }
0x1a2a   :  { %1657 = vmatmul.msk.f32.gmra.mxu0 %vm142_vm1, %v1411_v56 }
0x1aa5   :  { %v925_v30 = vpop.f32.mrf.mxu2 }
0x1aa6   :  { %v926_v38 = vadd.f32 %v2277_v36, %v925_v30 }
0x1aa8   :  { %949 = vrot.lane.b32.xlu1 %v926_v38, %s1846_s29  ;;  %v928_v31 = vadd.f32 %v926_v38, %v2071_v27 }
0x1aaa   :  { %v1641_v33 = vmul.f32 -1.442695, %v928_v31 }
0x1aac   :  { %1757 = vpow2.f32 %v1641_v33 }
0x1ab2   :  { %v1758_v34 = vpop.eup %1757 }
0x1ab3   :  { %v932_v39 = vadd.f32 1.0, %v1758_v34 }
0x1ab5   :  { %1759 = vrcp.f32 %v932_v39  ;;  %v944_v50 = vand.u32 2147483648, %v932_v39  ;;  %vm938_vm7 = vweird.f32 %v932_v39  ;;  %v942_v45 = vand.u32 2147483647, %v932_v39 }
0x1ab7   :  { %v945_v47 = vor.u32 1.1754944e-38, %v944_v50  ;;  %vm943_vm9 = vcmp.eq.f32.partialorder %v942_v45, 8.507059e+37 }
0x1abb   :  { %v1760_v35 = vpop.eup %1759 }
0x1abc   :  { %v934_v40 = vmul.f32 %v1760_v35, %v932_v39  ;;  %vm939_vm5 = vweird.f32 %v1760_v35 }
0x1abd   :  { %vm940_vm8 = vmor %vm938_vm7, %vm939_vm5 }
0x1abe   :  { %v935_v41 = vsub.f32 1.0, %v934_v40 }
0x1ac0   :  { %v936_v42 = vmul.f32 %v1760_v35, %v935_v41 }
0x1ac2   :  { %v937_v44 = vadd.f32 %v1760_v35, %v936_v42 }
0x1ac4   :  { %v941_v46 = vsel %vm940_vm8, %v1760_v35, %v937_v44 }
0x1ac5   :  { %v946_v54 = vsel %vm943_vm9, %v945_v47, %v941_v46 }
0x1ac6   :  { %v959_v2 = vsub.f32 1.0, %v946_v54  ;;  %v965_v7 = vmul.f32 %v946_v54, %v900_v4 }
0x1b1a   :  { %v950_v48 = vpop.permute.xlu1 %949 }
0x1b1b   :  { %v952_v59 = vmul.f32 %v950_v48, %v946_v54 }
0x1b1d   :  { %954 = vrot.lane.b32.xlu0 %v952_v59, %s1846_s29 }
0x1b8f   :  { %v955_v60 = vpop.permute.xlu0 %954 }
0x1b90   :  { %v957_v62 = vadd.f32 %v955_v60, %v2071_v27 }
0x1b92   :  { %1761 = vtanh.f32 %v957_v62 }
0x1b98   :  { %v1762_v63 = vpop.eup %1761 }
0x1b99   :  { %961 = vrot.lane.b32.xlu2 %v1762_v63, %s1847_s5 }
0x1bf3   :  { %v962_v3 = vpop.permute.xlu2 %961 }
0x1bf4   :  { %v964_v9 = vmul.f32 %v962_v3, %v959_v2 }
0x1bf6   :  { %v966_v10 = vadd.f32 %v965_v7, %v964_v9 }
0x1bf8   :  { %968 = vrot.lane.b32.xlu1 %v966_v10, %s1847_s5 }
0x1c6a   :  { %v969_v12 = vpop.permute.xlu1 %968 }
0x1c6b   :  { %971 = vst.msk [vmem:[#allocation2 + $0x10] sm:$0xff] %vm142_vm1, %v969_v12  ;;  %1642 = vmatmul.msk.f32.vlgmr.msra.gmra.mxu3 %vm142_vm1, %v969_v12 }
0x1c72   :  { %v1412_v15 = vld [vmem:[#allocation2 + $0x10] sm:$0xff] }
0x1c73   :  { %1658 = vmatmul.msk.f32.gmra.mxu0 %vm142_vm1, %v1412_v15 }
0x1cee   :  { %v991_v27 = vpop.f32.mrf.mxu3 }
0x1cef   :  { %v992_v16 = vadd.f32 %v2277_v36, %v991_v27 }
0x1cf1   :  { %1015 = vrot.lane.b32.xlu0 %v992_v16, %s1846_s29  ;;  %v994_v49 = vadd.f32 %v992_v16, %v2083_v61 }
0x1cf3   :  { %v1643_v17 = vmul.f32 -1.442695, %v994_v49 }
0x1cf5   :  { %1763 = vpow2.f32 %v1643_v17 }
0x1cfb   :  { %v1764_v18 = vpop.eup %1763 }
0x1cfc   :  { %v998_v19 = vadd.f32 1.0, %v1764_v18 }
0x1cfe   :  { %1765 = vrcp.f32 %v998_v19  ;;  %v1010_v23 = vand.u32 2147483648, %v998_v19  ;;  %vm1004_vm11 = vweird.f32 %v998_v19  ;;  %v1008_v24 = vand.u32 2147483647, %v998_v19 }
0x1d00   :  { %v1011_v53 = vor.u32 1.1754944e-38, %v1010_v23  ;;  %vm1009_vm13 = vcmp.eq.f32.partialorder %v1008_v24, 8.507059e+37 }
0x1d04   :  { %v1766_v20 = vpop.eup %1765 }
0x1d05   :  { %v1000_v51 = vmul.f32 %v1766_v20, %v998_v19  ;;  %vm1005_vm10 = vweird.f32 %v1766_v20 }
0x1d06   :  { %vm1006_vm12 = vmor %vm1004_vm11, %vm1005_vm10 }
0x1d07   :  { %v1001_v21 = vsub.f32 1.0, %v1000_v51 }
0x1d09   :  { %v1002_v8 = vmul.f32 %v1766_v20, %v1001_v21 }
0x1d0b   :  { %v1003_v22 = vadd.f32 %v1766_v20, %v1002_v8 }
0x1d0d   :  { %v1007_v11 = vsel %vm1006_vm12, %v1766_v20, %v1003_v22 }
0x1d0e   :  { %v1012_v26 = vsel %vm1009_vm13, %v1011_v53, %v1007_v11 }
0x1d0f   :  { %v1025_v4 = vsub.f32 1.0, %v1012_v26  ;;  %v1031_v56 = vmul.f32 %v1012_v26, %v966_v10 }
0x1d63   :  { %v1016_v25 = vpop.permute.xlu0 %1015 }
0x1d64   :  { %v1018_v0 = vmul.f32 %v1016_v25, %v1012_v26 }
0x1d66   :  { %1020 = vrot.lane.b32.xlu2 %v1018_v0, %s1846_s29 }
0x1dc0   :  { %v1021_v28 = vpop.permute.xlu2 %1020 }
0x1dc1   :  { %v1023_v1 = vadd.f32 %v1021_v28, %v2083_v61 }
0x1dc3   :  { %1767 = vtanh.f32 %v1023_v1 }
0x1dc9   :  { %v1768_v29 = vpop.eup %1767 }
0x1dca   :  { %1027 = vrot.lane.b32.xlu1 %v1768_v29, %s1847_s5 }
0x1e3c   :  { %v1028_v6 = vpop.permute.xlu1 %1027 }
0x1e3d   :  { %v1030_v30 = vmul.f32 %v1028_v6, %v1025_v4 }
0x1e3f   :  { %v1032_v38 = vadd.f32 %v1031_v56, %v1030_v30 }
0x1e41   :  { %1034 = vrot.lane.b32.xlu0 %v1032_v38, %s1847_s5 }
0x1eb3   :  { %v1035_v31 = vpop.permute.xlu0 %1034 }
0x1eb4   :  { %1037 = vst.msk [vmem:[#allocation2 + $0x18] sm:$0xff] %vm142_vm1, %v1035_v31  ;;  %1644 = vmatmul.msk.f32.vlgmr.msrb.gmra.mxu1 %vm142_vm1, %v1035_v31 }
0x1f31   :  { %v1057_v33 = vpop.f32.mrf.mxu1 }
0x1f32   :  { %v1058_v34 = vadd.f32 %v2277_v36, %v1057_v33 }
0x1f34   :  { %1081 = vrot.lane.b32.xlu2 %v1058_v34, %s1846_s29  ;;  %v1060_v61 = vadd.f32 %v1058_v34, %v2095_v32 }
0x1f36   :  { %v1645_v39 = vmul.f32 -1.442695, %v1060_v61 }
0x1f38   :  { %1769 = vpow2.f32 %v1645_v39 }
0x1f3e   :  { %v1770_v35 = vpop.eup %1769 }
0x1f3f   :  { %v1064_v40 = vadd.f32 1.0, %v1770_v35 }
0x1f41   :  { %1771 = vrcp.f32 %v1064_v40  ;;  %v1076_v46 = vand.u32 2147483648, %v1064_v40  ;;  %vm1070_vm15 = vweird.f32 %v1064_v40  ;;  %v1074_v47 = vand.u32 2147483647, %v1064_v40 }
0x1f43   :  { %v1077_v54 = vor.u32 1.1754944e-38, %v1076_v46  ;;  %vm1075_vm3 = vcmp.eq.f32.partialorder %v1074_v47, 8.507059e+37 }
0x1f47   :  { %v1772_v41 = vpop.eup %1771 }
0x1f48   :  { %v1066_v42 = vmul.f32 %v1772_v41, %v1064_v40  ;;  %vm1071_vm14 = vweird.f32 %v1772_v41 }
0x1f49   :  { %vm1072_vm2 = vmor %vm1070_vm15, %vm1071_vm14 }
0x1f4a   :  { %v1067_v44 = vsub.f32 1.0, %v1066_v42 }
0x1f4c   :  { %v1068_v50 = vmul.f32 %v1772_v41, %v1067_v44 }
0x1f4e   :  { %v1069_v45 = vadd.f32 %v1772_v41, %v1068_v50 }
0x1f50   :  { %v1073_v48 = vsel %vm1072_vm2, %v1772_v41, %v1069_v45 }
0x1f51   :  { %v1078_v60 = vsel %vm1075_vm3, %v1077_v54, %v1073_v48 }
0x1f52   :  { %v1091_v7 = vsub.f32 1.0, %v1078_v60  ;;  %v1097_v10 = vmul.f32 %v1078_v60, %v1032_v38 }
0x1f8e   :  { %v1082_v59 = vpop.permute.xlu2 %1081 }
0x1f8f   :  { %v1084_v62 = vmul.f32 %v1082_v59, %v1078_v60 }
0x1f91   :  { %1086 = vrot.lane.b32.xlu1 %v1084_v62, %s1846_s29 }
0x2003   :  { %v1087_v63 = vpop.permute.xlu1 %1086 }
0x2004   :  { %v1089_v2 = vadd.f32 %v1087_v63, %v2095_v32 }
0x2006   :  { %1773 = vtanh.f32 %v1089_v2 }
0x200c   :  { %v1774_v3 = vpop.eup %1773 }
0x200d   :  { %1093 = vrot.lane.b32.xlu0 %v1774_v3, %s1847_s5 }
0x207f   :  { %v1094_v9 = vpop.permute.xlu0 %1093 }
0x2080   :  { %v1096_v12 = vmul.f32 %v1094_v9, %v1091_v7 }
0x2082   :  { %v1098_v15 = vadd.f32 %v1097_v10, %v1096_v12 }
0x2084   :  { %1100 = vrot.lane.b32.xlu2 %v1098_v15, %s1847_s5 }
0x20de   :  { %v1101_v27 = vpop.permute.xlu2 %1100 }
0x20df   :  { %1103 = vst.msk [vmem:[#allocation2 + $0x20] sm:$0xff] %vm142_vm1, %v1101_v27  ;;  %1646 = vmatmul.msk.f32.vlgmr.msra.gmra.mxu2 %vm142_vm1, %v1101_v27 }
0x20e0   :  { %1672 = vmatpush.msra.mxu2 %v2224_v55 }
0x20e2   :  { %1673 = vmatpush.msra.mxu2 %v2229_v13 }
0x20e4   :  { %1674 = vmatpush.msra.mxu2 %v2235_v57 }
0x20e6   :  { %1675 = vmatpush.msra.mxu2 %v2241_v58 }
0x2162   :  { %v1123_v32 = vpop.f32.mrf.mxu2 }
0x2163   :  { %v1124_v16 = vadd.f32 %v2277_v36, %v1123_v32 }
0x2165   :  { %1147 = vrot.lane.b32.xlu1 %v1124_v16, %s1846_s29  ;;  %v1126_v49 = vadd.f32 %v1124_v16, %v2107_v5 }
0x2167   :  { %v1647_v17 = vmul.f32 -1.442695, %v1126_v49 }
0x2169   :  { %1775 = vpow2.f32 %v1647_v17 }
0x216f   :  { %v1776_v18 = vpop.eup %1775 }
0x2170   :  { %v1130_v19 = vadd.f32 1.0, %v1776_v18 }
0x2172   :  { %1777 = vrcp.f32 %v1130_v19  ;;  %v1142_v57 = vand.u32 2147483648, %v1130_v19  ;;  %vm1136_vm5 = vweird.f32 %v1130_v19  ;;  %v1140_v58 = vand.u32 2147483647, %v1130_v19 }
0x2174   :  { %v1143_v22 = vor.u32 1.1754944e-38, %v1142_v57  ;;  %vm1141_vm8 = vcmp.eq.f32.partialorder %v1140_v58, 8.507059e+37 }
0x2178   :  { %v1778_v20 = vpop.eup %1777 }
0x2179   :  { %v1132_v55 = vmul.f32 %v1778_v20, %v1130_v19  ;;  %vm1137_vm4 = vweird.f32 %v1778_v20 }
0x217a   :  { %vm1138_vm7 = vmor %vm1136_vm5, %vm1137_vm4 }
0x217b   :  { %v1133_v51 = vsub.f32 1.0, %v1132_v55 }
0x217d   :  { %v1134_v13 = vmul.f32 %v1778_v20, %v1133_v51 }
0x217f   :  { %v1135_v21 = vadd.f32 %v1778_v20, %v1134_v13 }
0x2181   :  { %v1139_v8 = vsel %vm1138_vm7, %v1778_v20, %v1135_v21 }
0x2182   :  { %v1144_v24 = vsel %vm1141_vm8, %v1143_v22, %v1139_v8 }
0x2183   :  { %v1157_v0 = vsub.f32 1.0, %v1144_v24  ;;  %v1163_v1 = vmul.f32 %v1144_v24, %v1098_v15 }
0x21d7   :  { %v1148_v23 = vpop.permute.xlu1 %1147 }
0x21d8   :  { %v1150_v11 = vmul.f32 %v1148_v23, %v1144_v24 }
0x21da   :  { %1152 = vrot.lane.b32.xlu0 %v1150_v11, %s1846_s29 }
0x224c   :  { %v1153_v53 = vpop.permute.xlu0 %1152 }
0x224d   :  { %v1155_v25 = vadd.f32 %v1153_v53, %v2107_v5 }
0x224f   :  { %1779 = vtanh.f32 %v1155_v25 }
0x2255   :  { %v1780_v26 = vpop.eup %1779 }
0x2256   :  { %1159 = vrot.lane.b32.xlu2 %v1780_v26, %s1847_s5  ;;  %v1413_v26 = vld [vmem:[#allocation2 + $0x18] sm:$0xff] }
0x22b0   :  { %v1160_v28 = vpop.permute.xlu2 %1159 }
0x22b1   :  { %v1162_v29 = vmul.f32 %v1160_v28, %v1157_v0 }
0x22b3   :  { %v1164_v4 = vadd.f32 %v1163_v1, %v1162_v29 }
0x22b5   :  { %1166 = vrot.lane.b32.xlu1 %v1164_v4, %s1847_s5 }
0x2327   :  { %v1167_v6 = vpop.permute.xlu1 %1166 }
0x2328   :  { %1169 = vst.msk [vmem:[#allocation2 + $0x28] sm:$0xff] %vm142_vm1, %v1167_v6  ;;  %1648 = vmatmul.msk.f32.vlgmr.msrb.gmra.mxu3 %vm142_vm1, %v1167_v6 }
0x232f   :  { %v1415_v0 = vld [vmem:[#allocation2 + $0x28] sm:$0xff] }
0x23ab   :  { %v1189_v56 = vpop.f32.mrf.mxu3 }
0x23ac   :  { %v1190_v30 = vadd.f32 %v2277_v36, %v1189_v56 }
0x23ae   :  { %1213 = vrot.lane.b32.xlu0 %v1190_v30, %s1846_s29  ;;  %v1192_v5 = vadd.f32 %v1190_v30, %v2119_v37  ;;  %v1502_v30 = vld [vmem:[%s2453_s11 + $0x18] sm:$0xff] }
0x23b0   :  { %v1649_v38 = vmul.f32 -1.442695, %v1192_v5 }
0x23b2   :  { %1781 = vpow2.f32 %v1649_v38  ;;  %v2360_v38 = vld [vmem:[%s2452_s10] ss:$0 sm:$0xff] }
0x23b8   :  { %v1782_v31 = vpop.eup %1781 }
0x23b9   :  { %v1196_v33 = vadd.f32 1.0, %v1782_v31  ;;  %v1500_v31 = vld [vmem:[%s2453_s11 + $0x8] sm:$0xff] }
0x23bb   :  { %1783 = vrcp.f32 %v1196_v33  ;;  %v1208_v41 = vand.u32 2147483648, %v1196_v33  ;;  %vm1202_vm10 = vweird.f32 %v1196_v33  ;;  %v1206_v42 = vand.u32 2147483647, %v1196_v33 }
0x23bd   :  { %v1209_v50 = vor.u32 1.1754944e-38, %v1208_v41  ;;  %vm1207_vm12 = vcmp.eq.f32.partialorder %v1206_v42, 8.507059e+37 }
0x23c1   :  { %v1784_v34 = vpop.eup %1783 }
0x23c2   :  { %v1198_v61 = vmul.f32 %v1784_v34, %v1196_v33  ;;  %vm1203_vm9 = vweird.f32 %v1784_v34 }
0x23c3   :  { %vm1204_vm11 = vmor %vm1202_vm10, %vm1203_vm9 }
0x23c4   :  { %v1199_v39 = vsub.f32 1.0, %v1198_v61  ;;  %v1499_v61 = vld [vmem:[%s2453_s11] sm:$0xff] }
0x23c6   :  { %v1200_v35 = vmul.f32 %v1784_v34, %v1199_v39 }
0x23c8   :  { %v1201_v40 = vadd.f32 %v1784_v34, %v1200_v35 }
0x23ca   :  { %v1205_v44 = vsel %vm1204_vm11, %v1784_v34, %v1201_v40 }
0x23cb   :  { %v1210_v46 = vsel %vm1207_vm12, %v1209_v50, %v1205_v44 }
0x23cc   :  { %v1223_v60 = vsub.f32 1.0, %v1210_v46  ;;  %v1229_v63 = vmul.f32 %v1210_v46, %v1164_v4 }
0x2420   :  { %v1214_v45 = vpop.permute.xlu0 %1213 }
0x2421   :  { %v1216_v47 = vmul.f32 %v1214_v45, %v1210_v46 }
0x2423   :  { %1218 = vrot.lane.b32.xlu2 %v1216_v47, %s1846_s29 }
0x247d   :  { %v1219_v48 = vpop.permute.xlu2 %1218 }
0x247e   :  { %v1221_v54 = vadd.f32 %v1219_v48, %v2119_v37 }
0x2480   :  { %1785 = vtanh.f32 %v1221_v54 }
0x2486   :  { %v1786_v59 = vpop.eup %1785 }
0x2487   :  { %1225 = vrot.lane.b32.xlu1 %v1786_v59, %s1847_s5 }
0x24f9   :  { %v1226_v62 = vpop.permute.xlu1 %1225 }
0x24fa   :  { %v1228_v2 = vmul.f32 %v1226_v62, %v1223_v60 }
0x24fc   :  { %v1230_v3 = vadd.f32 %v1229_v63, %v1228_v2 }
0x24fe   :  { %1232 = vrot.lane.b32.xlu0 %v1230_v3, %s1847_s5 }
0x2570   :  { %v1233_v7 = vpop.permute.xlu0 %1232 }
0x2571   :  { %1235 = vst.msk [vmem:[#allocation2 + $0x30] sm:$0xff] %vm142_vm1, %v1233_v7  ;;  %1650 = vmatmul.msk.f32.vlgmr.msra.gmra.mxu1 %vm142_vm1, %v1233_v7 }
0x2578   :  { %v1416_v28 = vld [vmem:[#allocation2 + $0x30] sm:$0xff] }
0x25ee   :  { %v1255_v9 = vpop.f32.mrf.mxu1 }
0x25ef   :  { %v1256_v10 = vadd.f32 %v2277_v36, %v1255_v9 }
0x25f1   :  { %1279 = vrot.lane.b32.xlu2 %v1256_v10, %s1846_s29  ;;  %v1258_v37 = vadd.f32 %v1256_v10, %v2131_v14 }
0x25f3   :  { %v1651_v12 = vmul.f32 -1.442695, %v1258_v37 }
0x25f5   :  { %1787 = vpow2.f32 %v1651_v12 }
0x25fb   :  { %v1788_v15 = vpop.eup %1787 }
0x25fc   :  { %v1262_v27 = vadd.f32 1.0, %v1788_v15 }
0x25fe   :  { %1789 = vrcp.f32 %v1262_v27  ;;  %v1274_v19 = vand.u32 2147483648, %v1262_v27  ;;  %vm1268_vm14 = vweird.f32 %v1262_v27  ;;  %v1272_v20 = vand.u32 2147483647, %v1262_v27 }
0x2600   :  { %v1275_v55 = vor.u32 1.1754944e-38, %v1274_v19  ;;  %vm1273_vm2 = vcmp.eq.f32.partialorder %v1272_v20, 8.507059e+37 }
0x2604   :  { %v1790_v32 = vpop.eup %1789 }
0x2605   :  { %v1264_v16 = vmul.f32 %v1790_v32, %v1262_v27  ;;  %vm1269_vm13 = vweird.f32 %v1790_v32 }
0x2606   :  { %vm1270_vm15 = vmor %vm1268_vm14, %vm1269_vm13 }
0x2607   :  { %v1265_v49 = vsub.f32 1.0, %v1264_v16 }
0x2609   :  { %v1266_v17 = vmul.f32 %v1790_v32, %v1265_v49 }
0x260b   :  { %v1267_v18 = vadd.f32 %v1790_v32, %v1266_v17 }
0x260d   :  { %v1271_v36 = vsel %vm1270_vm15, %v1790_v32, %v1267_v18 }
0x260e   :  { %v1276_v13 = vsel %vm1273_vm2, %v1275_v55, %v1271_v36 }
0x260f   :  { %v1289_v22 = vsub.f32 1.0, %v1276_v13  ;;  %v1295_v24 = vmul.f32 %v1276_v13, %v1230_v3  ;;  %v2385_v3 = vld [vmem:[%s2454_s12] ss:$0 sm:$0xff] }
0x264b   :  { %v1280_v51 = vpop.permute.xlu2 %1279 }
0x264c   :  { %v1282_v21 = vmul.f32 %v1280_v51, %v1276_v13 }
0x264e   :  { %1284 = vrot.lane.b32.xlu1 %v1282_v21, %s1846_s29 }
0x26c0   :  { %v1285_v57 = vpop.permute.xlu1 %1284 }
0x26c1   :  { %v1287_v58 = vadd.f32 %v1285_v57, %v2131_v14  ;;  %v1414_v14 = vld [vmem:[#allocation2 + $0x20] sm:$0xff] }
0x26c3   :  { %1791 = vtanh.f32 %v1287_v58 }
0x26c9   :  { %v1792_v8 = vpop.eup %1791 }
0x26ca   :  { %1291 = vrot.lane.b32.xlu0 %v1792_v8, %s1847_s5 }
0x273c   :  { %v1292_v23 = vpop.permute.xlu0 %1291 }
0x273d   :  { %v1294_v11 = vmul.f32 %v1292_v23, %v1289_v22 }
0x273f   :  { %v1296_v53 = vadd.f32 %v1295_v24, %v1294_v11 }
0x2741   :  { %1298 = vrot.lane.b32.xlu2 %v1296_v53, %s1847_s5 }
0x279b   :  { %v1299_v25 = vpop.permute.xlu2 %1298 }
0x279c   :  { %1301 = vst.msk [vmem:[#allocation2 + $0x38] sm:$0xff] %vm142_vm1, %v1299_v25  ;;  %1652 = vmatmul.msk.f32.vlgmr.msrb.gmra.mxu2 %vm142_vm1, %v1299_v25 }
0x27a3   :  { %v1417_v1 = vld [vmem:[#allocation2 + $0x38] sm:$0xff] }
0x27a4   :  { %1659 = vmatmul.msk.f32.vlgmr.msra.gmra.mxu2 %vm142_vm1, %v1413_v26 }
0x27ac   :  { %1660 = vmatmul.msk.f32.gmra.mxu2 %vm142_vm1, %v1414_v14 }
0x27b4   :  { %1661 = vmatmul.msk.f32.gmra.mxu2 %vm142_vm1, %v1415_v0 }
0x27bc   :  { %1662 = vmatmul.msk.f32.gmra.mxu2 %vm142_vm1, %v1416_v28  ;;  %v1467_v28 = vpop.f32.mrf.mxu0 }
0x27c4   :  { %1663 = vmatmul.msk.f32.gmra.mxu2 %vm142_vm1, %v1417_v1  ;;  %v1468_v1 = vadd.f32 %v2360_v38, %v1467_v28 }
0x281f   :  { %v1321_v29 = vpop.f32.mrf.mxu2 }
0x2820   :  { %v1322_v4 = vadd.f32 %v2174_v43, %v1321_v29  ;;  %v1501_v43 = vld [vmem:[%s2453_s11 + $0x10] sm:$0xff]  ;;  %v1491_v29 = vmax.f32 %v1468_v1, 0.0 }
0x2822   :  { %1793 = vtanh.f32 %v1322_v4  ;;  %v1470_v4 = vpop.f32.mrf.mxu0 }
0x2827   :  { %v1476_v56 = vpop.f32.mrf.mxu2 }
0x2828   :  { %v2344_v6 = vpop.eup %1793  ;;  %v1477_v34 = vadd.f32 %v2360_v38, %v1476_v56  ;;  %v1471_v56 = vadd.f32 %v2360_v38, %v1470_v4 }
0x2829   :  { %1326 = vrot.lane.b32.xlu1 %v2344_v6, %s1849_s23 }
0x282a   :  { %v1494_v35 = vmax.f32 %v1477_v34, 0.0 }
0x282f   :  { %v1479_v33 = vpop.f32.mrf.mxu2 }
0x2830   :  { %v1480_v40 = vadd.f32 %v2360_v38, %v1479_v33 }
0x2831   :  { %1378 = vrot.lane.b32.xlu1 %v2344_v6, %s1847_s5 }
0x2832   :  { %v1495_v42 = vmax.f32 %v1480_v40, 0.0 }
0x2837   :  { %v1482_v41 = vpop.f32.mrf.mxu2 }
0x2838   :  { %v1483_v44 = vadd.f32 %v2360_v38, %v1482_v41 }
0x283a   :  { %v1496_v45 = vmax.f32 %v1483_v44, 0.0 }
0x283f   :  { %v1485_v50 = vpop.f32.mrf.mxu2 }
0x2840   :  { %v1486_v46 = vadd.f32 %v2360_v38, %v1485_v50 }
0x2842   :  { %v1497_v47 = vmax.f32 %v1486_v46, 0.0 }
0x2847   :  { %v1488_v48 = vpop.f32.mrf.mxu2 }
0x2848   :  { %v1489_v54 = vadd.f32 %v2360_v38, %v1488_v48 }
0x284a   :  { %v1498_v59 = vmax.f32 %v1489_v54, 0.0 }
0x289b   :  { %v1327_v5 = vpop.permute.xlu1 %1326 }
0x289c   :  { %1653 = vmatpush.xpose.msk.msra.mxu3 %vm66_vm0, %v1327_v5  ;;  %v1473_v5 = vpop.f32.mrf.mxu0 }
0x289f   :  { %1654 = vmatmul.msk.f32.vlgmr.msra.gmra.mxu3 %vm66_vm0, %v2344_v6 }
0x28a0   :  { %1676 = vmatpush.msrb.mxu3 %v1502_v30 }
0x28a2   :  { %1677 = vmatpush.msrb.mxu3 %v1501_v43 }
0x28a3   :  { %v1379_v39 = vpop.permute.xlu1 %1378 }
0x28a4   :  { %1678 = vmatpush.msrb.mxu3 %v1500_v31  ;;  %1399 = vmatpush.msrb.mxu1 %v1379_v39 }
0x28a6   :  { %1679 = vmatpush.msrb.mxu3 %v1499_v61  ;;  %1543 = vmatpush.msra.mxu1 %v1502_v30  ;;  %v1492_v30 = vmax.f32 %v1471_v56, 0.0 }
0x28a7   :  { %1667 = vmatmul.msk.f32.vlgmr.msrb.gmra.mxu3 %vm142_vm1, %v1494_v35 }
0x28a8   :  { %1544 = vmatpush.msra.mxu1 %v1501_v43  ;;  %v1474_v43 = vadd.f32 %v2360_v38, %v1473_v5 }
0x28aa   :  { %1545 = vmatpush.msra.mxu1 %v1500_v31  ;;  %v1493_v31 = vmax.f32 %v1474_v43, 0.0 }
0x28ac   :  { %1546 = vmatpush.msra.mxu1 %v1499_v61 }
0x28af   :  { %1668 = vmatmul.msk.f32.gmra.mxu3 %vm142_vm1, %v1495_v42 }
0x28b7   :  { %1669 = vmatmul.msk.f32.gmra.mxu3 %vm142_vm1, %v1496_v45 }
0x28bf   :  { %1670 = vmatmul.msk.f32.gmra.mxu3 %vm142_vm1, %v1497_v47 }
0x28c7   :  { %1671 = vmatmul.msk.f32.gmra.mxu3 %vm142_vm1, %v1498_v59 }
0x2922   :  { %v1349_v60 = vpop.f32.mrf.mxu3 }
0x2923   :  { %v1352_v62 = vmul.f32 0.25, %v1349_v60 }
0x2925   :  { %v1353_v63 = vadd.f32 %v1352_v62, %v2196_v52 }
0x2927   :  { %v1354_v2 = vsel %vm714_vm6, %v1353_v63, -inf }
0x2928   :  { %1355 = vmax.xlane.f32.xlu0 %v1354_v2 }
0x292a   :  { %v1557_v7 = vpop.f32.mrf.mxu3 }
0x292b   :  { %v1558_v9 = vadd.f32 %v2385_v3, %v1557_v7 }
0x292d   :  { %1795 = vtanh.f32 %v1558_v9 }
0x2932   :  { %v1560_v10 = vpop.f32.mrf.mxu3 }
0x2933   :  { %v1796_v37 = vpop.eup %1795  ;;  %v1561_v12 = vadd.f32 %v2385_v3, %v1560_v10 }
0x2934   :  { %1583 = vst.msk [vmem:[%s2455_s13 + $0x18] sm:$0xff] %vm714_vm6, %v1796_v37 }
0x2935   :  { %1797 = vtanh.f32 %v1561_v12 }
0x293a   :  { %v1563_v52 = vpop.f32.mrf.mxu3 }
0x293b   :  { %v1798_v15 = vpop.eup %1797  ;;  %v1564_v27 = vadd.f32 %v2385_v3, %v1563_v52 }
0x293c   :  { %1584 = vst.msk [vmem:[%s2455_s13 + $0x20] sm:$0xff] %vm714_vm6, %v1798_v15 }
0x293d   :  { %1799 = vtanh.f32 %v1564_v27 }
0x2942   :  { %v1566_v32 = vpop.f32.mrf.mxu3 }
0x2943   :  { %v1800_v16 = vpop.eup %1799  ;;  %v1567_v49 = vadd.f32 %v2385_v3, %v1566_v32 }
0x2944   :  { %1585 = vst.msk [vmem:[%s2455_s13 + $0x28] sm:$0xff] %vm714_vm6, %v1800_v16 }
0x2945   :  { %1801 = vtanh.f32 %v1567_v49 }
0x294a   :  { %v1569_v17 = vpop.f32.mrf.mxu3 }
0x294b   :  { %v1802_v18 = vpop.eup %1801  ;;  %v1570_v19 = vadd.f32 %v2385_v3, %v1569_v17 }
0x294c   :  { %1586 = vst.msk [vmem:[%s2455_s13 + $0x30] sm:$0xff] %vm714_vm6, %v1802_v18 }
0x294d   :  { %1803 = vtanh.f32 %v1570_v19 }
0x2953   :  { %v1804_v20 = vpop.eup %1803 }
0x2954   :  { %1587 = vst.msk [vmem:[%s2455_s13 + $0x38] sm:$0xff] %vm714_vm6, %v1804_v20 }
0x299b   :  { %v1356_v36 = vpop.xlane.xlu0 %1355 }
0x299c   :  { %v1357_v55 = vsub.f32 %v1353_v63, %v1356_v36 }
0x299e   :  { %v1358_v51 = vmul.f32 1.442695, %v1357_v55 }
0x29a0   :  { %1805 = vpow2.f32 %v1358_v51 }
0x29a6   :  { %v1806_v13 = vpop.eup %1805 }
0x29a7   :  { %v1360_v21 = vsel %vm714_vm6, %v1806_v13, 0.0 }
0x29a8   :  { %1361 = vadd.xlane.f32.xlu2 %v1360_v21 }
0x2a1b   :  { %v1362_v57 = vpop.xlane.xlu2 %1361 }
0x2a1c   :  { %1807 = vrcp.f32 %v1362_v57  ;;  %v1374_v23 = vand.u32 2147483648, %v1362_v57  ;;  %v1372_v11 = vand.u32 2147483647, %v1362_v57  ;;  %vm1368_vm4 = vweird.f32 %v1362_v57 }
0x2a1e   :  { %v1375_v25 = vor.u32 1.1754944e-38, %v1374_v23  ;;  %vm1373_vm7 = vcmp.eq.f32.partialorder %v1372_v11, 8.507059e+37 }
0x2a22   :  { %v1808_v58 = vpop.eup %1807 }
0x2a23   :  { %v1364_v8 = vmul.f32 %v1808_v58, %v1362_v57  ;;  %vm1369_vm3 = vweird.f32 %v1808_v58 }
0x2a24   :  { %vm1370_vm5 = vmor %vm1368_vm4, %vm1369_vm3 }
0x2a25   :  { %v1365_v22 = vsub.f32 1.0, %v1364_v8 }
0x2a27   :  { %v1366_v24 = vmul.f32 %v1808_v58, %v1365_v22 }
0x2a29   :  { %v1367_v53 = vadd.f32 %v1808_v58, %v1366_v24 }
0x2a2b   :  { %v1371_v26 = vsel %vm1370_vm5, %v1808_v58, %v1367_v53 }
0x2a2c   :  { %v1376_v14 = vsel %vm1373_vm7, %v1375_v25, %v1371_v26 }
0x2a2d   :  { %v1377_v0 = vmul.f32 %v1806_v13, %v1376_v14 }
0x2a2f   :  { %1655 = vmatmul.msk.f32.vlgmr.msrb.gmra.mxu1 %vm714_vm6, %v1377_v0 }
0x2a37   :  { %1664 = vmatmul.msk.f32.vlgmr.msra.gmra.mxu1 %vm142_vm1, %v1491_v29 }
0x2a3f   :  { %1665 = vmatmul.msk.f32.gmra.mxu1 %vm142_vm1, %v1492_v30 }
0x2a47   :  { %1666 = vmatmul.msk.f32.gmra.mxu1 %vm142_vm1, %v1493_v31 }
0x2aac   :  { %v1401_v33 = vpop.f32.mrf.mxu1 }
0x2aad   :  { %1405 = vrot.lane.b32.xlu1 %v1401_v33, %s1850_s2 }
0x2ab4   :  { %v1548_v34 = vpop.f32.mrf.mxu1 }
0x2ab5   :  { %v1549_v61 = vadd.f32 %v2385_v3, %v1548_v34 }
0x2ab7   :  { %1809 = vtanh.f32 %v1549_v61 }
0x2abc   :  { %v1551_v39 = vpop.f32.mrf.mxu1 }
0x2abd   :  { %v1810_v35 = vpop.eup %1809  ;;  %v1552_v40 = vadd.f32 %v2385_v3, %v1551_v39 }
0x2abe   :  { %1580 = vst.msk [vmem:[%s2455_s13] sm:$0xff] %vm714_vm6, %v1810_v35 }
0x2abf   :  { %1811 = vtanh.f32 %v1552_v40 }
0x2ac4   :  { %v1554_v38 = vpop.f32.mrf.mxu1 }
0x2ac5   :  { %v1812_v41 = vpop.eup %1811  ;;  %v1555_v42 = vadd.f32 %v2385_v3, %v1554_v38 }
0x2ac6   :  { %1581 = vst.msk [vmem:[%s2455_s13 + $0x8] sm:$0xff] %vm714_vm6, %v1812_v41 }
0x2ac7   :  { %1813 = vtanh.f32 %v1555_v42 }
0x2acd   :  { %v1814_v44 = vpop.eup %1813 }
0x2ace   :  { %1582 = vst.msk [vmem:[%s2455_s13 + $0x10] sm:$0xff] %vm714_vm6, %v1814_v44 }
0x2b1f   :  { %v1406_v50 = vpop.permute.xlu1 %1405 }
0x2b20   :  { %v1408_v45 = vsel %vm66_vm0, %v2344_v6, %v1406_v50 }
0x2b21   :  { %1409 = vst.msk [vmem:[#allocation3] sm:$0xff] %vm142_vm1, %v1408_v45 }
0x2b22   :  { %1600 = dma.vmem_to_hbm [thread:$0]  %s1596_s6, 128, %s1598_s8, [#allocation4]  }
0x2b23   :  { %1844 = dma.done.wait [#allocation4], 128  }
0x2b24   :  { %1845 = vsyncadd [#allocation4], 4294967168 }
0x2b25   :  { %1607 = vsyncpa [#allocation4], 1 }

</bundles_post_ra>
